<compile_context>
chip_gen: v7x
topology: tpu7x:2x2x1
jax: 0.10.0
libtpu: 0.0.40
codegen_flags: <defaults>
</compile_context>

<pallas_src>
import functools

import jax
import jax.numpy as jnp
from jax import lax
from jax.experimental import pallas as pl
from jax.experimental.pallas import tpu as pltpu

_NEG_BIG = -1e30


def _chip_tiling():
    """(tn_target, tm_cap, is_v7x) from the local device kind, conservative fallback."""
    try:
        kind = jax.devices()[0].device_kind.lower()
    except Exception:
        kind = ""
    new_gen = ("v6" in kind) or ("v7" in kind) or ("7x" in kind)
    tn_target = 256 if new_gen else 128   # native MXU width on v6e/v7x; 128 on v5e/older
    tm_cap = 512 if new_gen else 256      # keep [TM, TN] f32 intermediates modest on v5e
    is_v7x = ("v7" in kind) or ("7x" in kind)
    return tn_target, tm_cap, is_v7x


def _make_kernel(inv_temp, has_pad):
    contract = (((1,), (1,)), ((), ()))   # q @ k.T without materializing a transpose

    def kernel(q_ref, k_ref, posdot_ref, pcnt_ref, sq_ref, *rest):
        if has_pad:
            bias_ref, out_ref, m_scr, l_scr = rest
        else:
            out_ref, m_scr, l_scr = rest

        j = pl.program_id(1)              # reduction (column) axis, innermost
        nj = pl.num_programs(1)

        @pl.when(j == 0)
        def _():
            m_scr[...] = jnp.full(m_scr.shape, _NEG_BIG, m_scr.dtype)
            l_scr[...] = jnp.zeros(l_scr.shape, l_scr.dtype)

        # Gram tile on the MXU: bf16 operands, f32 accumulation.
        dots = lax.dot_general(q_ref[...], k_ref[...], contract,
                               preferred_element_type=jnp.float32) * inv_temp  # [TM, TN]
        if has_pad:
            dots = dots + bias_ref[...]   # padded columns -> -1e30 (their exp -> 0)

        # Online accumulation of the row max and the rescaled exp-sum.
        m_prev = m_scr[...]                                              # [TM, 1]
        m_cur = jnp.maximum(m_prev, jnp.max(dots, axis=1, keepdims=True))
        e = jnp.exp(dots - m_cur)                                        # [TM, TN]
        l_scr[...] = l_scr[...] * jnp.exp(m_prev - m_cur) + jnp.sum(e, axis=1, keepdims=True)
        m_scr[...] = m_cur

        @pl.when(j == nj - 1)
        def _():
            m = m_scr[...]
            # Exclude the self-similarity from the denominator once, using the precomputed
            # per-row squared norm (computed from the same bf16-quantized features so it
            # matches the MXU diagonal). Clamp for robustness.
            l = jnp.maximum(l_scr[...] - jnp.exp(sq_ref[...] - m), 0.0)
            log_denom = m + jnp.log(l + 1e-8)                            # [TM, 1]
            pcnt = pcnt_ref[...]                                         # [TM, 1]
            mean_lpp = (posdot_ref[...] - pcnt * log_denom) / (pcnt + 1e-8)
            # Per-row-block partial sum, broadcast across a lane-dense output row.
            out_ref[...] = jnp.full(out_ref.shape, jnp.sum(mean_lpp), out_ref.dtype)

    return kernel


@functools.partial(jax.jit, static_argnames=('temperature',))
def label_masking_supcon_loss(features, labels, *, temperature=0.07):
    if features.ndim < 3:
        raise ValueError('`features` needs to be [batch_size, n_views, feature_dim].')
    if features.ndim > 3:
        features = features.reshape(features.shape[0], features.shape[1], -1)

    features = features.astype(jnp.float32)
    B, V, D = features.shape
    N = B * V
    inv_temp = float(1.0 / temperature)

    # Batch-major rows (row n -> batch n // V, view n % V). The loss is invariant to a
    # consistent row reorder; this avoids the wrapper transpose copy in HBM.
    contrast = features.reshape(N, D)
    contrast_bf16 = contrast.astype(jnp.bfloat16)

    # Label positivity at [B, B] only (never expanded to [N, N]).
    labels_f = labels.astype(jnp.float32)
    pos_b = (labels_f @ labels_f.T > 0).astype(jnp.float32)           # [B, B]
    g = jnp.sum(features, axis=1)                                      # [B, D]  sum over views
    pg = pos_b @ g                                                     # [B, D]
    # sum_m pos[n, m] * dots[n, m]  ==  f_n . (pos_b @ g)[n // V] / T   (f32 numerator).
    posdot = (jnp.einsum('bvd,bd->bv', features, pg) * inv_temp).reshape(N, 1)
    pcnt = jnp.repeat(V * jnp.sum(pos_b, axis=1), V).reshape(N, 1)     # positives per row
    # Per-row self-similarity / T, from the bf16-quantized features (matches MXU diagonal).
    cb = contrast_bf16.astype(jnp.float32)
    sqnorm = (jnp.sum(cb * cb, axis=1) * inv_temp).reshape(N, 1)

    # Pad N to a multiple of 128 so tiles stay MXU-friendly and stores lane-dense.
    N_pad = -(-N // 128) * 128
    pad = N_pad - N
    has_pad = pad > 0
    col_bias = None
    if has_pad:
        contrast_bf16 = jnp.pad(contrast_bf16, ((0, pad), (0, 0)))     # zero feature rows
        posdot = jnp.pad(posdot, ((0, pad), (0, 0)))                   # 0 -> numerator 0
        pcnt = jnp.pad(pcnt, ((0, pad), (0, 0)))                       # 0 -> mean_lpp 0
        sqnorm = jnp.pad(sqnorm, ((0, pad), (0, 0)), constant_values=_NEG_BIG)
        col_bias = jnp.concatenate(
            [jnp.zeros((1, N), jnp.float32),
             jnp.full((1, pad), _NEG_BIG, jnp.float32)], axis=1)       # [1, N_pad]

    # Generation-aware tile selection: TM (rows, resident) decoupled from TN (cols, streamed).
    tn_target, tm_cap, is_v7x = _chip_tiling()
    if D >= 2048:
        tm_cap = min(tm_cap, 256)      # respect v7x's 64 MiB VMEM for very wide features
    tm = next(t for t in (512, 256, 128) if t <= tm_cap and N_pad % t == 0)
    tn = tn_target if N_pad % tn_target == 0 else 128
    # v7x megacore: prefer an even number of row blocks so both TensorCores stay busy.
    if is_v7x and tm >= 256 and (N_pad // tm) % 2 == 1 and N_pad % (tm // 2) == 0:
        tm //= 2
    grid_m, grid_n = N_pad // tm, N_pad // tn

    kernel = _make_kernel(inv_temp, has_pad)

    in_specs = [
        pl.BlockSpec((tm, D), lambda i, j: (i, 0)),   # query rows (bf16, resident over j)
        pl.BlockSpec((tn, D), lambda i, j: (j, 0)),   # key columns (bf16, streamed)
        pl.BlockSpec((tm, 1), lambda i, j: (i, 0)),   # posdot
        pl.BlockSpec((tm, 1), lambda i, j: (i, 0)),   # positive counts
        pl.BlockSpec((tm, 1), lambda i, j: (i, 0)),   # self-similarity / T
    ]
    args = [contrast_bf16, contrast_bf16, posdot, pcnt, sqnorm]
    if has_pad:
        in_specs.append(pl.BlockSpec((1, tn), lambda i, j: (0, j)))    # padded-column bias
        args.append(col_bias)

    out = pl.pallas_call(
        kernel,
        out_shape=jax.ShapeDtypeStruct((grid_m, tm), jnp.float32),
        grid_spec=pltpu.PrefetchScalarGridSpec(
            num_scalar_prefetch=0,
            grid=(grid_m, grid_n),
            in_specs=in_specs,
            out_specs=pl.BlockSpec((1, tm), lambda i, j: (i, 0)),
            scratch_shapes=[pltpu.VMEM((tm, 1), jnp.float32),   # running row max
                            pltpu.VMEM((tm, 1), jnp.float32)],  # running exp-sum
        ),
        compiler_params=pltpu.CompilerParams(
            dimension_semantics=("parallel", "arbitrary"),
            vmem_limit_bytes=32 * 1024 * 1024,   # ample for these tiles; safe on v7x's 64 MiB
        ),
    )(*args)

    # loss = -mean_log_prob_pos.mean(); padded rows contribute exactly 0, divide by real N.
    return -(jnp.sum(out[:, 0]) / N)


def reference_loss(features, labels, temperature=0.07):
    """Pure-JAX (f32) transcription of the PyTorch forward, for correctness checks."""
    feats = features.reshape(features.shape[0], features.shape[1], -1).astype(jnp.float32)
    B, V = feats.shape[0], feats.shape[1]
    contrast = jnp.concatenate([feats[:, v, :] for v in range(V)], axis=0)   # [N, D]
    labels_f = labels.astype(jnp.float32)
    pos = (labels_f @ labels_f.T > 0).astype(jnp.float32)
    pos = jnp.tile(pos, (V, V))                                              # torch .repeat(V, V)
    dots = contrast @ contrast.T / temperature
    logits = dots - jnp.max(dots, axis=1, keepdims=True)
    N = B * V
    lmask = 1.0 - jnp.eye(N, dtype=jnp.float32)
    exp_logits = jnp.exp(logits) * lmask
    log_prob = logits - jnp.log(exp_logits.sum(1, keepdims=True) + 1e-8)
    mean_lpp = (pos * log_prob).sum(1) / (pos.sum(1) + 1e-8)
    return -mean_lpp.mean()


if __name__ == "__main__":
    key = jax.random.PRNGKey(0)
    k1, k2, k3, k4 = jax.random.split(key, 4)

    # Small case (exercises the N-padding / column-bias path): B=4, V=2, D=128 -> N=8.
    B, V, D, L = 4, 2, 128, 16
    features = jax.random.normal(k1, (B, V, D), dtype=jnp.float32)
    features = features / jnp.linalg.norm(features, axis=-1, keepdims=True)
    labels = (jax.random.uniform(k2, (B, L)) < 0.4).astype(jnp.float32)

    loss = jax.block_until_ready(label_masking_supcon_loss(features, labels, temperature=0.07))
    ref = reference_loss(features, labels, temperature=0.07)
    assert bool(jnp.isfinite(loss)), float(loss)
    assert jnp.allclose(loss, ref, rtol=2e-2, atol=3e-2), (float(loss), float(ref))

    # Multi-block case (no padding): B=192, V=2, D=128 -> N=384, tiled 128-blocks.
    B2, V2, D2, L2 = 192, 2, 128, 16
    features2 = jax.random.normal(k3, (B2, V2, D2), dtype=jnp.float32)
    features2 = features2 / jnp.linalg.norm(features2, axis=-1, keepdims=True)
    labels2 = (jax.random.uniform(k4, (B2, L2)) < 0.4).astype(jnp.float32)

    loss2 = jax.block_until_ready(label_masking_supcon_loss(features2, labels2, temperature=0.07))
    ref2 = reference_loss(features2, labels2, temperature=0.07)
    assert bool(jnp.isfinite(loss2)), float(loss2)
    assert jnp.allclose(loss2, ref2, rtol=2e-2, atol=3e-2), (float(loss2), float(ref2))

    print("KERNEL_OK")
</pallas_src>

<mosaic_0001>
module attributes {stable_mosaic.version = 11 : i64} {
  func.func @kernel(%arg0: i32, %arg1: i32, %arg2: memref<128x128xbf16, #tpu.memory_space<vmem>>, %arg3: memref<128x128xbf16, #tpu.memory_space<vmem>>, %arg4: memref<128x1xf32, #tpu.memory_space<vmem>>, %arg5: memref<128x1xf32, #tpu.memory_space<vmem>>, %arg6: memref<128x1xf32, #tpu.memory_space<vmem>>, %arg7: memref<1x128xf32, #tpu.memory_space<vmem>>, %arg8: memref<1x128xf32, #tpu.memory_space<vmem>>, %arg9: memref<128x1xf32, #tpu.memory_space<vmem>>, %arg10: memref<128x1xf32, #tpu.memory_space<vmem>>) attributes {dimension_semantics = [#tpu.dimension_semantics<parallel>, #tpu.dimension_semantics<arbitrary>], iteration_bounds = array<i64: 1, 1>, scalar_prefetch = 0 : i64, scratch_operands = 2 : i64, tpu.core_type = #tpu.core_type<tc>, window_params = [{transform_indices = @transform_0, window_bounds = array<i64: 128, 128>}, {transform_indices = @transform_1, window_bounds = array<i64: 128, 128>}, {transform_indices = @transform_2, window_bounds = array<i64: 128, 1>}, {transform_indices = @transform_3, window_bounds = array<i64: 128, 1>}, {transform_indices = @transform_4, window_bounds = array<i64: 128, 1>}, {transform_indices = @transform_5, window_bounds = array<i64: 1, 128>}, {transform_indices = @transform_6, window_bounds = array<i64: 1, 128>}]} {
    %c0_i32 = arith.constant 0 : i32
    %0 = arith.cmpi eq, %arg1, %c0_i32 : i32
    %1 = arith.extui %0 : i1 to i32
    %c0_i32_0 = arith.constant 0 : i32
    %2 = arith.cmpi ne, %1, %c0_i32_0 : i32
    scf.if %2 {
      %cst_19 = arith.constant -1.000000e+30 : f32
      %30 = vector.broadcast %cst_19 : f32 to vector<128x1xf32>
      %c0_20 = arith.constant 0 : index
      %c0_21 = arith.constant 0 : index
      %31 = vector.load %arg9[%c0_20, %c0_21] : memref<128x1xf32, #tpu.memory_space<vmem>>, vector<128x1xf32>
      tpu.vector_store %arg9[%c0_20, %c0_21], %30 {strides = array<i32>} : memref<128x1xf32, #tpu.memory_space<vmem>>, vector<128x1xf32>,
      %cst_22 = arith.constant 0.000000e+00 : f32
      %32 = vector.broadcast %cst_22 : f32 to vector<128x1xf32>
      %c0_23 = arith.constant 0 : index
      %c0_24 = arith.constant 0 : index
      %33 = vector.load %arg10[%c0_23, %c0_24] : memref<128x1xf32, #tpu.memory_space<vmem>>, vector<128x1xf32>
      tpu.vector_store %arg10[%c0_23, %c0_24], %32 {strides = array<i32>} : memref<128x1xf32, #tpu.memory_space<vmem>>, vector<128x1xf32>,
    } else {
    }
    %c0 = arith.constant 0 : index
    %c0_1 = arith.constant 0 : index
    %3 = vector.load %arg2[%c0, %c0_1] : memref<128x128xbf16, #tpu.memory_space<vmem>>, vector<128x128xbf16>
    %c0_2 = arith.constant 0 : index
    %c0_3 = arith.constant 0 : index
    %4 = vector.load %arg3[%c0_2, %c0_3] : memref<128x128xbf16, #tpu.memory_space<vmem>>, vector<128x128xbf16>
    %cst = arith.constant dense<0.000000e+00> : vector<128x128xf32>
    %5 = tpu.matmul %3, %4, %cst {dimension_numbers = #tpu.dot_dimension_numbers<[1], [1], [0], [0], [0, 0, 1, 0], [], []>} : vector<128x128xbf16>, vector<128x128xbf16>, vector<128x128xf32> -> vector<128x128xf32>
    %cst_4 = arith.constant 14.2857141 : f32
    %6 = vector.broadcast %cst_4 : f32 to vector<128x128xf32>
    %7 = arith.mulf %5, %6 : vector<128x128xf32>
    %c0_5 = arith.constant 0 : index
    %c0_6 = arith.constant 0 : index
    %8 = vector.load %arg7[%c0_5, %c0_6] : memref<1x128xf32, #tpu.memory_space<vmem>>, vector<1x128xf32>
    %9 = vector.broadcast %8 : vector<1x128xf32> to vector<128x128xf32>
    %10 = arith.addf %7, %9 : vector<128x128xf32>
    %c0_7 = arith.constant 0 : index
    %c0_8 = arith.constant 0 : index
    %11 = vector.load %arg9[%c0_7, %c0_8] : memref<128x1xf32, #tpu.memory_space<vmem>>, vector<128x1xf32>
    %cst_9 = arith.constant dense<0xFF800000> : vector<128xf32>
    %12 = vector.multi_reduction <maximumf>, %10, %cst_9 [1] : vector<128x128xf32> to vector<128xf32>
    %13 = vector.shape_cast %12 : vector<128xf32> to vector<128x1xf32>
    %14 = arith.maximumf %11, %13 : vector<128x1xf32>
    %15 = vector.broadcast %14 : vector<128x1xf32> to vector<128x128xf32>
    %16 = arith.subf %10, %15 : vector<128x128xf32>
    %17 = math.exp %16 : vector<128x128xf32>
    %c0_10 = arith.constant 0 : index
    %c0_11 = arith.constant 0 : index
    %18 = vector.load %arg10[%c0_10, %c0_11] : memref<128x1xf32, #tpu.memory_space<vmem>>, vector<128x1xf32>
    %19 = arith.subf %11, %14 : vector<128x1xf32>
    %20 = math.exp %19 : vector<128x1xf32>
    %21 = arith.mulf %18, %20 : vector<128x1xf32>
    %cst_12 = arith.constant dense<0.000000e+00> : vector<128xf32>
    %22 = vector.multi_reduction <add>, %17, %cst_12 [1] : vector<128x128xf32> to vector<128xf32>
    %23 = vector.shape_cast %22 : vector<128xf32> to vector<128x1xf32>
    %24 = arith.addf %21, %23 : vector<128x1xf32>
    %c0_13 = arith.constant 0 : index
    %c0_14 = arith.constant 0 : index
    %25 = vector.load %arg10[%c0_13, %c0_14] : memref<128x1xf32, #tpu.memory_space<vmem>>, vector<128x1xf32>
    tpu.vector_store %arg10[%c0_13, %c0_14], %24 {strides = array<i32>} : memref<128x1xf32, #tpu.memory_space<vmem>>, vector<128x1xf32>,
    %c0_15 = arith.constant 0 : index
    %c0_16 = arith.constant 0 : index
    %26 = vector.load %arg9[%c0_15, %c0_16] : memref<128x1xf32, #tpu.memory_space<vmem>>, vector<128x1xf32>
    tpu.vector_store %arg9[%c0_15, %c0_16], %14 {strides = array<i32>} : memref<128x1xf32, #tpu.memory_space<vmem>>, vector<128x1xf32>,
    %c0_i32_17 = arith.constant 0 : i32
    %27 = arith.cmpi eq, %arg1, %c0_i32_17 : i32
    %28 = arith.extui %27 : i1 to i32
    %c0_i32_18 = arith.constant 0 : i32
    %29 = arith.cmpi ne, %28, %c0_i32_18 : i32
    scf.if %29 {
      %c0_19 = arith.constant 0 : index
      %c0_20 = arith.constant 0 : index
      %30 = vector.load %arg9[%c0_19, %c0_20] : memref<128x1xf32, #tpu.memory_space<vmem>>, vector<128x1xf32>
      %c0_21 = arith.constant 0 : index
      %c0_22 = arith.constant 0 : index
      %31 = vector.load %arg10[%c0_21, %c0_22] : memref<128x1xf32, #tpu.memory_space<vmem>>, vector<128x1xf32>
      %c0_23 = arith.constant 0 : index
      %c0_24 = arith.constant 0 : index
      %32 = vector.load %arg6[%c0_23, %c0_24] : memref<128x1xf32, #tpu.memory_space<vmem>>, vector<128x1xf32>
      %33 = arith.subf %32, %30 : vector<128x1xf32>
      %34 = math.exp %33 : vector<128x1xf32>
      %35 = arith.subf %31, %34 : vector<128x1xf32>
      %cst_25 = arith.constant 0.000000e+00 : f32
      %36 = vector.broadcast %cst_25 : f32 to vector<128x1xf32>
      %37 = arith.maximumf %35, %36 : vector<128x1xf32>
      %cst_26 = arith.constant 9.99999993E-9 : f32
      %38 = vector.broadcast %cst_26 : f32 to vector<128x1xf32>
      %39 = arith.addf %37, %38 : vector<128x1xf32>
      %40 = math.log %39 : vector<128x1xf32>
      %41 = arith.addf %30, %40 : vector<128x1xf32>
      %c0_27 = arith.constant 0 : index
      %c0_28 = arith.constant 0 : index
      %42 = vector.load %arg5[%c0_27, %c0_28] : memref<128x1xf32, #tpu.memory_space<vmem>>, vector<128x1xf32>
      %c0_29 = arith.constant 0 : index
      %c0_30 = arith.constant 0 : index
      %43 = vector.load %arg4[%c0_29, %c0_30] : memref<128x1xf32, #tpu.memory_space<vmem>>, vector<128x1xf32>
      %44 = arith.mulf %42, %41 : vector<128x1xf32>
      %45 = arith.subf %43, %44 : vector<128x1xf32>
      %cst_31 = arith.constant 9.99999993E-9 : f32
      %46 = vector.broadcast %cst_31 : f32 to vector<128x1xf32>
      %47 = arith.addf %42, %46 : vector<128x1xf32>
      %48 = arith.divf %45, %47 : vector<128x1xf32>
      %49 = vector.shape_cast %48 : vector<128x1xf32> to vector<1x128x1xf32>
      %cst_32 = arith.constant dense<0.000000e+00> : vector<1xf32>
      %50 = vector.multi_reduction <add>, %49, %cst_32 [1, 2] : vector<1x128x1xf32> to vector<1xf32>
      %51 = vector.shape_cast %50 : vector<1xf32> to vector<1x1x1xf32>
      %52 = vector.extract %51[0, 0, 0] : f32 from vector<1x1x1xf32>
      %53 = vector.broadcast %52 : f32 to vector<1x128xf32>
      %c0_33 = arith.constant 0 : index
      %c0_34 = arith.constant 0 : index
      %54 = vector.load %arg8[%c0_33, %c0_34] : memref<1x128xf32, #tpu.memory_space<vmem>>, vector<1x128xf32>
      tpu.vector_store %arg8[%c0_33, %c0_34], %53 {strides = array<i32>} : memref<1x128xf32, #tpu.memory_space<vmem>>, vector<1x128xf32>,
    } else {
    }
    return
  }
  func.func @transform_0(%arg0: i32, %arg1: i32) -> (i32, i32) {
    %c0_i32 = arith.constant 0 : i32
    %c0_i32_0 = arith.constant 0 : i32
    return %arg0, %c0_i32 : i32, i32
  }
  func.func @transform_1(%arg0: i32, %arg1: i32) -> (i32, i32) {
    %c0_i32 = arith.constant 0 : i32
    %c0_i32_0 = arith.constant 0 : i32
    return %arg1, %c0_i32 : i32, i32
  }
  func.func @transform_2(%arg0: i32, %arg1: i32) -> (i32, i32) {
    %c0_i32 = arith.constant 0 : i32
    %c0_i32_0 = arith.constant 0 : i32
    return %arg0, %c0_i32 : i32, i32
  }
  func.func @transform_3(%arg0: i32, %arg1: i32) -> (i32, i32) {
    %c0_i32 = arith.constant 0 : i32
    %c0_i32_0 = arith.constant 0 : i32
    return %arg0, %c0_i32 : i32, i32
  }
  func.func @transform_4(%arg0: i32, %arg1: i32) -> (i32, i32) {
    %c0_i32 = arith.constant 0 : i32
    %c0_i32_0 = arith.constant 0 : i32
    return %arg0, %c0_i32 : i32, i32
  }
  func.func @transform_5(%arg0: i32, %arg1: i32) -> (i32, i32) {
    %c0_i32 = arith.constant 0 : i32
    %c0_i32_0 = arith.constant 0 : i32
    return %c0_i32, %arg1 : i32, i32
  }
  func.func @transform_6(%arg0: i32, %arg1: i32) -> (i32, i32) {
    %c0_i32 = arith.constant 0 : i32
    %c0_i32_0 = arith.constant 0 : i32
    return %arg0, %c0_i32 : i32, i32
  }
}

</mosaic_0001>

<bundles_post_ra>
// kernel: label_masking_supcon_loss.1
= control target key start
LH: loop header
LB: loop body
LE: loop exit
PB: predicated region body
PF: predicated region fallthrough
CT: control target
= control target key end

     0   :  { %vm28_vm0 = vcmask 7168   ;;  %v1295_v16 = vmov -1e+30   ;;  %v1296_v56 = vmov 0   ;;  %s2142_s1 = inlined_call_operand.vmem [shape: bf16[128,128], index: 1, kind: input, shape index: {}, may-alias: {0,1}]   ;;  %s2143_s0 = inlined_call_operand.vmem [shape: bf16[128,128], index: 0, kind: input, shape index: {}, may-alias: {0,1}]   ;;  %s2144_s5 = inlined_call_operand.vmem [shape: f32[1,128], index: 5, kind: input, shape index: {}]   ;;  %s2145_s4 = inlined_call_operand.vmem [shape: f32[128,1], index: 4, kind: input, shape index: {}]   ;;  %s2146_s3 = inlined_call_operand.vmem [shape: f32[128,1], index: 3, kind: input, shape index: {}]   ;;  %s2147_s2 = inlined_call_operand.vmem [shape: f32[128,1], index: 2, kind: input, shape index: {}]   ;;  %s2148_s6 = inlined_call_operand.vmem [shape: f32[1,128], index: 6, kind: output, shape index: {}]  }
   0x1   :  { %v1119_v0 = vld [vmem:[%s2142_s1] sm:$0xff]   ;;  %v1120_v1 = vld [vmem:[%s2142_s1 + $0x8] sm:$0xff]   ;;  %v1121_v2 = vld [vmem:[%s2142_s1 + $0x10] sm:$0xff]   ;;  %31 = vst.msk [vmem:[#allocation2 + $0x10] sm:$0xff] %vm28_vm0, %v1295_v16  ;;  %1118 = vset.pattern.permute.xlu1 %v1296_v56  ;;  %1117 = vset.pattern.permute.xlu0 %v1296_v56 }
   0x2   :  { %1064 = vmatprep.subr.bf16.mxu0 %v1119_v0  ;;  %1096 = vmatprep.subr.bf16.mxu1 %v1119_v0  ;;  %v1127_v3 = vld [vmem:[%s2143_s0] sm:$0xff]   ;;  %v1122_v5 = vld [vmem:[%s2142_s1 + $0x18] sm:$0xff]   ;;  %v1124_v7 = vld [vmem:[%s2142_s1 + $0x28] sm:$0xff]   ;;  %29 = vst.msk [vmem:[#allocation2] sm:$0xff] %vm28_vm0, %v1295_v16 }
   0x3   :  { %1065 = vmatpush3.bf16.xpose.msra.mxu0 %v1119_v0  ;;  %1104 = vmatpush3.bf16.xpose.msra.mxu1 %v1119_v0  ;;  %v1131_v4 = vld [vmem:[%s2143_s0 + $0x20] sm:$0xff]   ;;  %v1125_v8 = vld [vmem:[%s2142_s1 + $0x30] sm:$0xff]   ;;  %v1126_v9 = vld [vmem:[%s2142_s1 + $0x38] sm:$0xff]   ;;  %30 = vst.msk [vmem:[#allocation2 + $0x8] sm:$0xff] %vm28_vm0, %v1295_v16 }
   0x4   :  { %1066 = vmatprep.subr.bf16.mxu0 %v1120_v1  ;;  %1097 = vmatprep.subr.bf16.mxu1 %v1120_v1  ;;  %v1123_v6 = vld [vmem:[%s2142_s1 + $0x20] sm:$0xff]   ;;  %v1128_v10 = vld [vmem:[%s2143_s0 + $0x8] sm:$0xff]   ;;  %v1129_v12 = vld [vmem:[%s2143_s0 + $0x10] sm:$0xff]   ;;  %32 = vst.msk [vmem:[#allocation2 + $0x18] sm:$0xff] %vm28_vm0, %v1295_v16 }
   0x5   :  { %1080 = vmatprep.mubr.bf16.mxu0 %v1127_v3  ;;  %1088 = vmatprep.mubr.bf16.mxu1 %v1131_v4  ;;  %v1132_v11 = vld [vmem:[%s2143_s0 + $0x28] sm:$0xff]   ;;  %v1133_v13 = vld [vmem:[%s2143_s0 + $0x30] sm:$0xff]   ;;  %v1130_v14 = vld [vmem:[%s2143_s0 + $0x18] sm:$0xff]   ;;  %33 = vst.msk [vmem:[#allocation2 + $0x20] sm:$0xff] %vm28_vm0, %v1295_v16 }
   0x6   :  { %v1134_v15 = vld [vmem:[%s2143_s0 + $0x38] sm:$0xff]   ;;  %34 = vst.msk [vmem:[#allocation2 + $0x28] sm:$0xff] %vm28_vm0, %v1295_v16  ;;  %35 = vst.msk [vmem:[#allocation2 + $0x30] sm:$0xff] %vm28_vm0, %v1295_v16  ;;  %v1400_v18 = vld [vmem:[%s2144_s5] ss:$0 sm:$0xff] }
   0x7   :  { %36 = vst.msk [vmem:[#allocation2 + $0x38] sm:$0xff] %vm28_vm0, %v1295_v16  ;;  %37 = vst.msk [vmem:[#allocation2 + $0x40] sm:$0xff] %vm28_vm0, %v1295_v16 }
   0x8   :  { %38 = vst.msk [vmem:[#allocation2 + $0x48] sm:$0xff] %vm28_vm0, %v1295_v16  ;;  %39 = vst.msk [vmem:[#allocation2 + $0x50] sm:$0xff] %vm28_vm0, %v1295_v16  ;;  %v1482_v4 = vld [vmem:[#allocation2 + $0x10] sm:$0xff] }
   0x9   :  { %40 = vst.msk [vmem:[#allocation2 + $0x58] sm:$0xff] %vm28_vm0, %v1295_v16  ;;  %41 = vst.msk [vmem:[#allocation2 + $0x60] sm:$0xff] %vm28_vm0, %v1295_v16 }
   0xa   :  { %42 = vst.msk [vmem:[#allocation2 + $0x68] sm:$0xff] %vm28_vm0, %v1295_v16  ;;  %43 = vst.msk [vmem:[#allocation2 + $0x70] sm:$0xff] %vm28_vm0, %v1295_v16 }
   0xb   :  { %1067 = vmatpush3.bf16.xpose.msra.mxu0 %v1120_v1  ;;  %1105 = vmatpush3.bf16.xpose.msra.mxu1 %v1120_v1  ;;  %44 = vst.msk [vmem:[#allocation2 + $0x78] sm:$0xff] %vm28_vm0, %v1295_v16  ;;  %v1297_v1 = vmov 0.0  }
   0xc   :  { %1068 = vmatprep.subr.bf16.mxu0 %v1121_v2  ;;  %1098 = vmatprep.subr.bf16.mxu1 %v1121_v2  ;;  %45 = vst.msk [vmem:[#allocation3] sm:$0xff] %vm28_vm0, %v1297_v1  ;;  %46 = vst.msk [vmem:[#allocation3 + $0x8] sm:$0xff] %vm28_vm0, %v1297_v1 }
   0xd   :  { %47 = vst.msk [vmem:[#allocation3 + $0x10] sm:$0xff] %vm28_vm0, %v1297_v1  ;;  %48 = vst.msk [vmem:[#allocation3 + $0x18] sm:$0xff] %vm28_vm0, %v1297_v1 }
   0xe   :  { %49 = vst.msk [vmem:[#allocation3 + $0x20] sm:$0xff] %vm28_vm0, %v1297_v1  ;;  %50 = vst.msk [vmem:[#allocation3 + $0x28] sm:$0xff] %vm28_vm0, %v1297_v1 }
   0xf   :  { %51 = vst.msk [vmem:[#allocation3 + $0x30] sm:$0xff] %vm28_vm0, %v1297_v1  ;;  %52 = vst.msk [vmem:[#allocation3 + $0x38] sm:$0xff] %vm28_vm0, %v1297_v1 }
  0x10   :  { %53 = vst.msk [vmem:[#allocation3 + $0x40] sm:$0xff] %vm28_vm0, %v1297_v1  ;;  %54 = vst.msk [vmem:[#allocation3 + $0x48] sm:$0xff] %vm28_vm0, %v1297_v1 }
  0x11   :  { %55 = vst.msk [vmem:[#allocation3 + $0x50] sm:$0xff] %vm28_vm0, %v1297_v1  ;;  %56 = vst.msk [vmem:[#allocation3 + $0x58] sm:$0xff] %vm28_vm0, %v1297_v1 }
  0x12   :  { %57 = vst.msk [vmem:[#allocation3 + $0x60] sm:$0xff] %vm28_vm0, %v1297_v1  ;;  %58 = vst.msk [vmem:[#allocation3 + $0x68] sm:$0xff] %vm28_vm0, %v1297_v1 }
  0x13   :  { %1069 = vmatpush3.bf16.xpose.msra.mxu0 %v1121_v2  ;;  %1106 = vmatpush3.bf16.xpose.msra.mxu1 %v1121_v2  ;;  %59 = vst.msk [vmem:[#allocation3 + $0x70] sm:$0xff] %vm28_vm0, %v1297_v1  ;;  %60 = vst.msk [vmem:[#allocation3 + $0x78] sm:$0xff] %vm28_vm0, %v1297_v1 }
  0x14   :  { %1070 = vmatprep.subr.bf16.mxu0 %v1122_v5  ;;  %1099 = vmatprep.subr.bf16.mxu1 %v1122_v5 }
  0x1b   :  { %1071 = vmatpush3.bf16.xpose.msra.mxu0 %v1122_v5  ;;  %1107 = vmatpush3.bf16.xpose.msra.mxu1 %v1122_v5  ;;  %v1484_v5 = vld [vmem:[#allocation2] sm:$0xff] }
  0x1c   :  { %1072 = vmatprep.subr.bf16.mxu0 %v1123_v6  ;;  %1100 = vmatprep.subr.bf16.mxu1 %v1123_v6 }
  0x23   :  { %1073 = vmatpush3.bf16.xpose.msra.mxu0 %v1123_v6  ;;  %1108 = vmatpush3.bf16.xpose.msra.mxu1 %v1123_v6 }
  0x24   :  { %1074 = vmatprep.subr.bf16.mxu0 %v1124_v7  ;;  %1101 = vmatprep.subr.bf16.mxu1 %v1124_v7 }
  0x2b   :  { %1075 = vmatpush3.bf16.xpose.msra.mxu0 %v1124_v7  ;;  %1109 = vmatpush3.bf16.xpose.msra.mxu1 %v1124_v7 }
  0x2c   :  { %1076 = vmatprep.subr.bf16.mxu0 %v1125_v8  ;;  %1102 = vmatprep.subr.bf16.mxu1 %v1125_v8 }
  0x33   :  { %1077 = vmatpush3.bf16.xpose.msra.mxu0 %v1125_v8  ;;  %1110 = vmatpush3.bf16.xpose.msra.mxu1 %v1125_v8 }
  0x34   :  { %1078 = vmatprep.subr.bf16.mxu0 %v1126_v9  ;;  %1103 = vmatprep.subr.bf16.mxu1 %v1126_v9 }
  0x3b   :  { %1079 = vmatpush3.bf16.xpose.msra.mxu0 %v1126_v9  ;;  %1111 = vmatpush3.bf16.xpose.msra.mxu1 %v1126_v9 }
  0x42   :  { %1081 = vmatmul.mubr.bf16.vlgmr.msra.gmra.mrb[0].mxu0 %v1128_v10  ;;  %1089 = vmatmul.mubr.bf16.vlgmr.msra.gmra.mrb[0].mxu1 %v1132_v11  ;;  %v1492_v10 = vld [vmem:[#allocation2 + $0x18] sm:$0xff] }
  0x43   :  { %1084 = vmatprep.mubr.bf16.mxu0 %v1129_v12  ;;  %1092 = vmatprep.mubr.bf16.mxu1 %v1133_v13  ;;  %v1499_v12 = vld [vmem:[#allocation2 + $0x8] sm:$0xff] }
  0x4a   :  { %1085 = vmatmul.mubr.bf16.gmra.mrb[4].mxu0 %v1130_v14  ;;  %1093 = vmatmul.mubr.bf16.gmra.mrb[4].mxu1 %v1134_v15 }
 0x115   :  { %v1082_v17 = vpop.f32.mrb[0].mxu0  ;;  %v1090_v19 = vpop.f32.mrb[0].mxu1 }
 0x116   :  { %v288_v20 = vmul.f32 14.285714, %v1082_v17  ;;  %v223_v21 = vpop.f32.mrb[1].mxu0  ;;  %v255_v22 = vpop.f32.mrb[1].mxu1  ;;  %v296_v52 = vmul.f32 14.285714, %v1090_v19 }
 0x117   :  { %v286_v23 = vmul.f32 14.285714, %v223_v21  ;;  %v1083_v24 = vpop.f32.mrb[2].mxu0  ;;  %v1091_v25 = vpop.f32.mrb[2].mxu1  ;;  %v294_v48 = vmul.f32 14.285714, %v255_v22 }
 0x118   :  { %v289_v26 = vmul.f32 14.285714, %v1083_v24  ;;  %v226_v27 = vpop.f32.mrb[3].mxu0  ;;  %v1403_v28 = vadd.f32 %v1400_v18, %v288_v20  ;;  %v258_v29 = vpop.f32.mrb[3].mxu1  ;;  %v297_v54 = vmul.f32 14.285714, %v1091_v25  ;;  %v1442_v58 = vadd.f32 %v1400_v18, %v296_v52 }
 0x119   :  { %v287_v30 = vmul.f32 14.285714, %v226_v27  ;;  %v1406_v31 = vadd.f32 %v1400_v18, %v286_v23  ;;  %v295_v49 = vmul.f32 14.285714, %v258_v29  ;;  %v1434_v53 = vadd.f32 %v1400_v18, %v294_v48  ;;  %v1517_v19 = vld [vmem:[#allocation2 + $0x20] sm:$0xff]  ;;  %v1523_v21 = vld [vmem:[#allocation2 + $0x38] sm:$0xff] }
 0x11a   :  { %345 = vmax.xlane.f32.xlu1 %v1403_v28  ;;  %v1411_v32 = vadd.f32 %v1400_v18, %v289_v26  ;;  %v1446_v60 = vadd.f32 %v1400_v18, %v297_v54  ;;  %v1532_v26 = vld [vmem:[#allocation2 + $0x30] sm:$0xff]  ;;  %v1538_v29 = vld [vmem:[#allocation2 + $0x28] sm:$0xff]  ;;  %v1576_v52 = vld [vmem:[#allocation2 + $0x58] sm:$0xff] }
 0x11b   :  { %341 = vmax.xlane.f32.xlu0 %v1406_v31  ;;  %v1414_v34 = vadd.f32 %v1400_v18, %v287_v30  ;;  %v1438_v55 = vadd.f32 %v1400_v18, %v295_v49  ;;  %v1569_v48 = vld [vmem:[#allocation2 + $0x50] sm:$0xff] }
 0x11d   :  { %v1086_v33 = vpop.f32.mrb[4].mxu0  ;;  %v1094_v35 = vpop.f32.mrb[4].mxu1 }
 0x11e   :  { %347 = vmax.xlane.f32.xlu1 %v1411_v32  ;;  %v239_v36 = vpop.f32.mrb[5].mxu0  ;;  %v271_v37 = vpop.f32.mrb[5].mxu1  ;;  %v292_v44 = vmul.f32 14.285714, %v1086_v33  ;;  %v300_v61 = vmul.f32 14.285714, %v1094_v35 }
 0x11f   :  { %v290_v38 = vmul.f32 14.285714, %v239_v36  ;;  %343 = vmax.xlane.f32.xlu0 %v1414_v34  ;;  %v1087_v39 = vpop.f32.mrb[6].mxu0  ;;  %v1095_v40 = vpop.f32.mrb[6].mxu1  ;;  %v298_v57 = vmul.f32 14.285714, %v271_v37 }
 0x120   :  { %v293_v41 = vmul.f32 14.285714, %v1087_v39  ;;  %v242_v42 = vpop.f32.mrb[7].mxu0  ;;  %v274_v43 = vpop.f32.mrb[7].mxu1  ;;  %v1427_v50 = vadd.f32 %v1400_v18, %v292_v44  ;;  %v301_v59 = vmul.f32 14.285714, %v1095_v40  ;;  %v1474_v2 = vadd.f32 %v1400_v18, %v300_v61 }
 0x121   :  { %v1419_v45 = vadd.f32 %v1400_v18, %v290_v38  ;;  %v291_v46 = vmul.f32 14.285714, %v242_v42  ;;  %v1450_v62 = vadd.f32 %v1400_v18, %v298_v57  ;;  %v299_v63 = vmul.f32 14.285714, %v274_v43  ;;  %v1550_v38 = vld [vmem:[#allocation2 + $0x40] sm:$0xff]  ;;  %v1557_v40 = vld [vmem:[#allocation2 + $0x48] sm:$0xff] }
 0x122   :  { %v1422_v47 = vadd.f32 %v1400_v18, %v293_v41  ;;  %v1454_v0 = vadd.f32 %v1400_v18, %v301_v59 }
 0x123   :  { %349 = vmax.xlane.f32.xlu0 %v1419_v45  ;;  %v1430_v51 = vadd.f32 %v1400_v18, %v291_v46  ;;  %v1478_v3 = vadd.f32 %v1400_v18, %v299_v63  ;;  %v1589_v63 = vld [vmem:[#allocation2 + $0x60] sm:$0xff] }
 0x124   :  { %355 = vmax.xlane.f32.xlu1 %v1422_v47 }
 0x127   :  { %353 = vmax.xlane.f32.xlu0 %v1427_v50 }
 0x128   :  { %351 = vmax.xlane.f32.xlu1 %v1430_v51 }
 0x12b   :  { %357 = vmax.xlane.f32.xlu0 %v1434_v53 }
 0x12c   :  { %359 = vmax.xlane.f32.xlu1 %v1438_v55 }
 0x12f   :  { %361 = vmax.xlane.f32.xlu0 %v1442_v58 }
 0x130   :  { %363 = vmax.xlane.f32.xlu1 %v1446_v60 }
 0x133   :  { %365 = vmax.xlane.f32.xlu0 %v1450_v62 }
 0x134   :  { %371 = vmax.xlane.f32.xlu1 %v1454_v0 }
 0x137   :  { %369 = vmax.xlane.f32.xlu0 %v1474_v2 }
 0x138   :  { %367 = vmax.xlane.f32.xlu1 %v1478_v3 }
 0x1a7   :  { %v346_v6 = vpop.xlane.xlu1 %345 }
 0x1a8   :  { %v1487_v7 = vmax.f32 %v1482_v4, %v346_v6  ;;  %v342_v8 = vpop.xlane.xlu0 %341  ;;  %v1596_v6 = vld [vmem:[#allocation2 + $0x78] sm:$0xff] }
 0x1a9   :  { %v1490_v9 = vmax.f32 %v1484_v5, %v342_v8 }
 0x1aa   :  { %v535_v11 = vsub.f32 %v1482_v4, %v1487_v7  ;;  %664 = vst.msk [vmem:[#allocation2 + $0x10] sm:$0xff] %vm28_vm0, %v1487_v7  ;;  %401 = vperm.xlu1 %1118, %v1487_v7  }
 0x1ab   :  { %v533_v13 = vsub.f32 %v1484_v5, %v1490_v9  ;;  %662 = vst.msk [vmem:[#allocation2] sm:$0xff] %vm28_vm0, %v1490_v9  ;;  %v348_v14 = vpop.xlane.xlu1 %347  ;;  %391 = vperm.xlu0 %1117, %v1490_v9  }
 0x1ac   :  { %v1507_v15 = vmax.f32 %v1492_v10, %v348_v14  ;;  %v344_v16 = vpop.xlane.xlu0 %343 }
 0x1ad   :  { %v1510_v17 = vmax.f32 %v1499_v12, %v344_v16 }
 0x1ae   :  { %665 = vst.msk [vmem:[#allocation2 + $0x18] sm:$0xff] %vm28_vm0, %v1507_v15  ;;  %406 = vperm.xlu1 %1118, %v1507_v15  }
 0x1af   :  { %663 = vst.msk [vmem:[#allocation2 + $0x8] sm:$0xff] %vm28_vm0, %v1510_v17  ;;  %v2154_v5 = vsub.f32 %v1499_v12, %v1510_v17 }
 0x1b0   :  { %v350_v22 = vpop.xlane.xlu0 %349 }
 0x1b1   :  { %v1526_v23 = vmax.f32 %v1517_v19, %v350_v22  ;;  %v356_v24 = vpop.xlane.xlu1 %355  ;;  %v551_v9 = vmul.f32 1.442695, %v2154_v5 }
 0x1b2   :  { %v1529_v25 = vmax.f32 %v1523_v21, %v356_v24  ;;  %396 = vperm.xlu1 %1118, %v1510_v17  }
 0x1b3   :  { %666 = vst.msk [vmem:[#allocation2 + $0x20] sm:$0xff] %vm28_vm0, %v1526_v23 }
 0x1b4   :  { %669 = vst.msk [vmem:[#allocation2 + $0x38] sm:$0xff] %vm28_vm0, %v1529_v25  ;;  %v354_v33 = vpop.xlane.xlu0 %353  ;;  %v2156_v12 = vsub.f32 %v1523_v21, %v1529_v25 }
 0x1b5   :  { %v1545_v35 = vmax.f32 %v1532_v26, %v354_v33  ;;  %v352_v36 = vpop.xlane.xlu1 %351  ;;  %v1609_v33 = vld [vmem:[#allocation2 + $0x70] sm:$0xff]  ;;  %v1688_v7 = vld [vmem:[#allocation2 + $0x18] sm:$0xff] }
 0x1b6   :  { %v1548_v37 = vmax.f32 %v1538_v29, %v352_v36  ;;  %v563_v17 = vmul.f32 1.442695, %v2156_v12 }
 0x1b7   :  { %668 = vst.msk [vmem:[#allocation2 + $0x30] sm:$0xff] %vm28_vm0, %v1545_v35  ;;  %421 = vperm.xlu1 %1118, %v1545_v35   ;;  %v2157_v21 = vsub.f32 %v1532_v26, %v1545_v35 }
 0x1b8   :  { %667 = vst.msk [vmem:[#allocation2 + $0x28] sm:$0xff] %vm28_vm0, %v1548_v37  ;;  %v358_v42 = vpop.xlane.xlu0 %357 }
 0x1b9   :  { %v360_v43 = vpop.xlane.xlu1 %359  ;;  %v1564_v44 = vmax.f32 %v1550_v38, %v358_v42  ;;  %v1616_v42 = vld [vmem:[#allocation2 + $0x68] sm:$0xff] }
 0x1ba   :  { %v1567_v46 = vmax.f32 %v1557_v40, %v360_v43 }
 0x1bb   :  { %670 = vst.msk [vmem:[#allocation2 + $0x40] sm:$0xff] %vm28_vm0, %v1564_v44  ;;  %411 = vperm.xlu1 %1118, %v1526_v23   ;;  %v2159_v26 = vsub.f32 %v1550_v38, %v1564_v44 }
 0x1bc   :  { %671 = vst.msk [vmem:[#allocation2 + $0x48] sm:$0xff] %vm28_vm0, %v1567_v46  ;;  %436 = vperm.xlu0 %1117, %v1567_v46   ;;  %v362_v56 = vpop.xlane.xlu0 %361 }
 0x1bd   :  { %v364_v57 = vpop.xlane.xlu1 %363  ;;  %v1584_v59 = vmax.f32 %v1569_v48, %v362_v56  ;;  %v565_v35 = vmul.f32 1.442695, %v2159_v26 }
 0x1be   :  { %v1587_v61 = vmax.f32 %v1576_v52, %v364_v57 }
 0x1bf   :  { %672 = vst.msk [vmem:[#allocation2 + $0x50] sm:$0xff] %vm28_vm0, %v1584_v59  ;;  %416 = vperm.xlu1 %1118, %v1548_v37  }
 0x1c0   :  { %673 = vst.msk [vmem:[#allocation2 + $0x58] sm:$0xff] %vm28_vm0, %v1587_v61  ;;  %446 = vperm.xlu0 %1117, %v1587_v61   ;;  %v366_v14 = vpop.xlane.xlu0 %365 }
 0x1c1   :  { %v372_v16 = vpop.xlane.xlu1 %371  ;;  %v1604_v22 = vmax.f32 %v1589_v63, %v366_v14 }
 0x1c2   :  { %v1607_v24 = vmax.f32 %v1596_v6, %v372_v16  ;;  %v1737_v38 = vld [vmem:[#allocation2 + $0x40] sm:$0xff] }
 0x1c3   :  { %426 = vperm.xlu1 %1118, %v1529_v25   ;;  %674 = vst.msk [vmem:[#allocation2 + $0x60] sm:$0xff] %vm28_vm0, %v1604_v22  ;;  %v2158_v25 = vsub.f32 %v1538_v29, %v1548_v37  ;;  %v719_v29 = vld [vmem:[%s2145_s4 + $0x30] sm:$0xff]  ;;  %v2160_v37 = vsub.f32 %v1557_v40, %v1567_v46  ;;  %v2161_v46 = vsub.f32 %v1569_v48, %v1584_v59 }
 0x1c4   :  { %677 = vst.msk [vmem:[#allocation2 + $0x78] sm:$0xff] %vm28_vm0, %v1607_v24  ;;  %v370_v56 = vpop.xlane.xlu0 %369 }
 0x1c5   :  { %v368_v57 = vpop.xlane.xlu1 %367  ;;  %v1623_v14 = vmax.f32 %v1609_v33, %v370_v56 }
 0x1c6   :  { %v1626_v16 = vmax.f32 %v1616_v42, %v368_v57 }
 0x1c7   :  { %431 = vperm.xlu1 %1118, %v1564_v44   ;;  %676 = vst.msk [vmem:[#allocation2 + $0x70] sm:$0xff] %vm28_vm0, %v1623_v14  ;;  %v721_v44 = vld [vmem:[%s2145_s4 + $0x40] sm:$0xff] }
 0x1c8   :  { %675 = vst.msk [vmem:[#allocation2 + $0x68] sm:$0xff] %vm28_vm0, %v1626_v16  ;;  %456 = vperm.xlu0 %1117, %v1626_v16   ;;  %v737_v48 = vsub.f32 %v721_v44, %v1737_v38 }
 0x1cb   :  { %441 = vperm.xlu1 %1118, %v1584_v59  }
 0x1cc   :  { %466 = vperm.xlu0 %1117, %v1607_v24  }
 0x1cf   :  { %451 = vperm.xlu1 %1118, %v1604_v22  }
 0x1d3   :  { %461 = vperm.xlu1 %1118, %v1623_v14  }
 0x229   :  { %v402_v56 = vpop.permute.xlu1 %401 }
 0x22a   :  { %v392_v57 = vpop.permute.xlu0 %391  ;;  %v471_v41 = vsub.f32 %v1403_v28, %v402_v56 }
 0x22b   :  { %v469_v36 = vsub.f32 %v1406_v31, %v392_v57 }
 0x22c   :  { %v489_v27 = vmul.f32 1.442695, %v471_v41 }
 0x22d   :  { %v485_v8 = vmul.f32 1.442695, %v469_v36  ;;  %v407_v1 = vpop.permute.xlu1 %406 }
 0x22e   :  { %v472_v43 = vsub.f32 %v1411_v32, %v407_v1 }
 0x22f   :  { %1135 = vpow2.f32 %v485_v8 }
 0x230   :  { %v491_v54 = vmul.f32 1.442695, %v472_v43 }
 0x231   :  { %v397_v49 = vpop.permute.xlu1 %396 }
 0x232   :  { %1137 = vpow2.f32 %v491_v54  ;;  %v470_v39 = vsub.f32 %v1414_v34, %v397_v49 }
 0x234   :  { %v487_v30 = vmul.f32 1.442695, %v470_v39 }
 0x236   :  { %1139 = vpow2.f32 %v487_v30  ;;  %v422_v20 = vpop.permute.xlu1 %421 }
 0x237   :  { %1141 = vpow2.f32 %v489_v27  ;;  %v475_v31 = vsub.f32 %v1427_v50, %v422_v20 }
 0x239   :  { %v1136_v18 = vpop.eup %1135  ;;  %v497_v57 = vmul.f32 1.442695, %v475_v31 }
 0x23a   :  { %597 = vadd.xlane.f32.xlu1 %v1136_v18  ;;  %v412_v36 = vpop.permute.xlu1 %411 }
 0x23b   :  { %v473_v32 = vsub.f32 %v1419_v45, %v412_v36  ;;  %v437_v43 = vpop.permute.xlu0 %436 }
 0x23c   :  { %v1138_v1 = vpop.eup %1137  ;;  %v478_v27 = vsub.f32 %v1438_v55, %v437_v43 }
 0x23d   :  { %v493_v8 = vmul.f32 1.442695, %v473_v32 }
 0x23e   :  { %603 = vadd.xlane.f32.xlu1 %v1138_v1  ;;  %v417_v28 = vpop.permute.xlu1 %416  ;;  %v503_v49 = vmul.f32 1.442695, %v478_v27 }
 0x23f   :  { %1143 = vpow2.f32 %v493_v8  ;;  %v474_v34 = vsub.f32 %v1430_v51, %v417_v28  ;;  %v447_v18 = vpop.permute.xlu0 %446 }
 0x240   :  { %v1140_v39 = vpop.eup %1139  ;;  %1145 = vpow2.f32 %v497_v57  ;;  %v480_v54 = vsub.f32 %v1446_v60, %v447_v18 }
 0x241   :  { %v495_v30 = vmul.f32 1.442695, %v474_v34  ;;  %599 = vadd.xlane.f32.xlu0 %v1140_v39  ;;  %v1142_v20 = vpop.eup %1141 }
 0x242   :  { %v427_v50 = vpop.permute.xlu1 %426  ;;  %v507_v55 = vmul.f32 1.442695, %v480_v54 }
 0x243   :  { %1147 = vpow2.f32 %v495_v30  ;;  %v476_v45 = vsub.f32 %v1422_v47, %v427_v50 }
 0x245   :  { %v499_v41 = vmul.f32 1.442695, %v476_v45  ;;  %601 = vadd.xlane.f32.xlu0 %v1142_v20 }
 0x246   :  { %v432_v56 = vpop.permute.xlu1 %431 }
 0x247   :  { %1149 = vpow2.f32 %v499_v41  ;;  %v477_v51 = vsub.f32 %v1434_v53, %v432_v56  ;;  %v457_v31 = vpop.permute.xlu0 %456 }
 0x248   :  { %1151 = vpow2.f32 %v503_v49  ;;  %v482_v1 = vsub.f32 %v1478_v3, %v457_v31  ;;  %v715_v31 = vld [vmem:[%s2145_s4 + $0x10] sm:$0xff] }
 0x249   :  { %v1144_v36 = vpop.eup %1143  ;;  %v501_v32 = vmul.f32 1.442695, %v477_v51 }
 0x24a   :  { %605 = vadd.xlane.f32.xlu0 %v1144_v36  ;;  %v442_v8 = vpop.permute.xlu1 %441  ;;  %v1146_v57 = vpop.eup %1145  ;;  %v511_v34 = vmul.f32 1.442695, %v482_v1  ;;  %v713_v36 = vld [vmem:[%s2145_s4] sm:$0xff] }
 0x24b   :  { %1153 = vpow2.f32 %v501_v32  ;;  %v479_v47 = vsub.f32 %v1442_v58, %v442_v8  ;;  %v467_v43 = vpop.permute.xlu0 %466  ;;  %v1666_v32 = vld [vmem:[#allocation2] sm:$0xff]  ;;  %v553_v8 = vmul.f32 1.442695, %v535_v11  ;;  %v716_v11 = vld [vmem:[%s2145_s4 + $0x18] sm:$0xff] }
 0x24c   :  { %1155 = vpow2.f32 %v507_v55  ;;  %v484_v53 = vsub.f32 %v1454_v0, %v467_v43  ;;  %v549_v55 = vmul.f32 1.442695, %v533_v13  ;;  %v714_v43 = vld [vmem:[%s2145_s4 + $0x8] sm:$0xff] }
 0x24d   :  { %v1148_v28 = vpop.eup %1147  ;;  %v505_v60 = vmul.f32 1.442695, %v479_v47  ;;  %v729_v47 = vsub.f32 %v713_v36, %v1666_v32 }
 0x24e   :  { %609 = vadd.xlane.f32.xlu0 %v1146_v57  ;;  %607 = vadd.xlane.f32.xlu1 %v1148_v28  ;;  %v452_v39 = vpop.permute.xlu1 %451  ;;  %v515_v50 = vmul.f32 1.442695, %v484_v53  ;;  %v1679_v57 = vld [vmem:[#allocation2 + $0x8] sm:$0xff]  ;;  %v2153_v28 = vsub.f32 %v1492_v10, %v1507_v15  ;;  %v2155_v10 = vsub.f32 %v1517_v19, %v1526_v23  ;;  %v1699_v53 = vld [vmem:[#allocation2 + $0x20] sm:$0xff]  ;;  %v720_v19 = vld [vmem:[%s2145_s4 + $0x38] sm:$0xff] }
 0x24f   :  { %1157 = vpow2.f32 %v505_v60  ;;  %v481_v30 = vsub.f32 %v1450_v62, %v452_v39  ;;  %v730_v4 = vsub.f32 %v714_v43, %v1679_v57  ;;  %v717_v39 = vld [vmem:[%s2145_s4 + $0x20] sm:$0xff]  ;;  %v561_v23 = vmul.f32 1.442695, %v2157_v21 }
 0x250   :  { %1159 = vpow2.f32 %v511_v34  ;;  %v555_v60 = vmul.f32 1.442695, %v2153_v28  ;;  %v745_v34 = vmul.f32 1.442695, %v729_v47  ;;  %v557_v15 = vmul.f32 1.442695, %v2155_v10 }
 0x251   :  { %v1150_v3 = vpop.eup %1149  ;;  %v509_v27 = vmul.f32 1.442695, %v481_v30  ;;  %v732_v30 = vsub.f32 %v716_v11, %v1688_v7  ;;  %v722_v47 = vld [vmem:[%s2145_s4 + $0x48] sm:$0xff]  ;;  %v2162_v28 = vsub.f32 %v1576_v52, %v1587_v61  ;;  %v520_v11 = vld [vmem:[#allocation3 + $0x18] sm:$0xff]  ;;  %v1759_v10 = vld [vmem:[#allocation2 + $0x50] sm:$0xff]  ;;  %v2164_v21 = vsub.f32 %v1596_v6, %v1607_v24 }
 0x252   :  { %611 = vadd.xlane.f32.xlu1 %v1150_v3  ;;  %v462_v58 = vpop.permute.xlu1 %461  ;;  %v1152_v45 = vpop.eup %1151  ;;  %v747_v3 = vmul.f32 1.442695, %v730_v4  ;;  %v728_v6 = vld [vmem:[%s2145_s4 + $0x78] sm:$0xff] }
 0x253   :  { %1161 = vpow2.f32 %v509_v27  ;;  %v483_v18 = vsub.f32 %v1474_v2, %v462_v58  ;;  %v1658_v2 = vld [vmem:[#allocation2 + $0x10] sm:$0xff]  ;;  %v1705_v27 = vld [vmem:[#allocation2 + $0x38] sm:$0xff]  ;;  %v733_v58 = vsub.f32 %v717_v39, %v1699_v53 }
 0x254   :  { %1163 = vpow2.f32 %v515_v50  ;;  %v731_v1 = vsub.f32 %v715_v31, %v1658_v2  ;;  %v559_v50 = vmul.f32 1.442695, %v2158_v25 }
 0x255   :  { %v1154_v20 = vpop.eup %1153  ;;  %v513_v41 = vmul.f32 1.442695, %v483_v18  ;;  %v1717_v18 = vld [vmem:[#allocation2 + $0x28] sm:$0xff] }
 0x256   :  { %615 = vadd.xlane.f32.xlu1 %v1152_v45  ;;  %613 = vadd.xlane.f32.xlu0 %v1154_v20  ;;  %v1156_v0 = vpop.eup %1155  ;;  %v749_v13 = vmul.f32 1.442695, %v731_v1  ;;  %v718_v45 = vld [vmem:[%s2145_s4 + $0x28] sm:$0xff]  ;;  %v736_v20 = vsub.f32 %v720_v19, %v1705_v27  ;;  %v569_v1 = vmul.f32 1.442695, %v2161_v46 }
 0x257   :  { %1165 = vpow2.f32 %v513_v41  ;;  %v751_v41 = vmul.f32 1.442695, %v732_v30  ;;  %v1770_v30 = vld [vmem:[#allocation2 + $0x58] sm:$0xff] }
 0x258   :  { %1167 = vpow2.f32 %v549_v55  ;;  %v759_v55 = vmul.f32 1.442695, %v736_v20  ;;  %v1788_v20 = vld [vmem:[#allocation2 + $0x78] sm:$0xff] }
 0x259   :  { %v1158_v49 = vpop.eup %1157  ;;  %1169 = vpow2.f32 %v553_v8  ;;  %v1746_v8 = vld [vmem:[#allocation2 + $0x48] sm:$0xff]  ;;  %2166 = vst [vmem:[#allocation5_spill] sm:$0xff] %v1788_v20 }
 0x25a   :  { %619 = vadd.xlane.f32.xlu1 %v1156_v0  ;;  %617 = vadd.xlane.f32.xlu0 %v1158_v49  ;;  %v1160_v62 = vpop.eup %1159  ;;  %1171 = vpow2.f32 %v555_v60  ;;  %v1726_v0 = vld [vmem:[#allocation2 + $0x30] sm:$0xff]  ;;  %v567_v49 = vmul.f32 1.442695, %v2160_v37  ;;  %v571_v60 = vmul.f32 1.442695, %v2162_v28  ;;  %v738_v52 = vsub.f32 %v722_v47, %v1746_v8  ;;  %v1814_v28 = vld [vmem:[#allocation2 + $0x68] sm:$0xff] }
 0x25b   :  { %1173 = vpow2.f32 %v551_v9  ;;  %v735_v36 = vsub.f32 %v719_v29, %v1726_v0  ;;  %v1796_v29 = vld [vmem:[#allocation2 + $0x70] sm:$0xff]  ;;  %2170 = vst [vmem:[#allocation7_spill] sm:$0xff] %v1814_v28 }
 0x25c   :  { %1175 = vpow2.f32 %v749_v13  ;;  %2167 = vst [vmem:[#allocation6_spill] sm:$0xff] %v1796_v29  ;;  %v727_v37 = vld [vmem:[%s2145_s4 + $0x70] sm:$0xff] }
 0x25d   :  { %v1162_v54 = vpop.eup %1161  ;;  %1177 = vpow2.f32 %v745_v34  ;;  %v757_v61 = vmul.f32 1.442695, %v735_v36  ;;  %v519_v47 = vld [vmem:[#allocation3 + $0x10] sm:$0xff] }
 0x25e   :  { %623 = vadd.xlane.f32.xlu1 %v1160_v62  ;;  %621 = vadd.xlane.f32.xlu0 %v1162_v54  ;;  %v1164_v56 = vpop.eup %1163  ;;  %1179 = vpow2.f32 %v557_v15  ;;  %v517_v54 = vld [vmem:[#allocation3] sm:$0xff]  ;;  %v723_v15 = vld [vmem:[%s2145_s4 + $0x50] sm:$0xff] }
 0x25f   :  { %1181 = vpow2.f32 %v563_v17  ;;  %v2163_v17 = vsub.f32 %v1589_v63, %v1604_v22  ;;  %v725_v63 = vld [vmem:[%s2145_s4 + $0x60] sm:$0xff]  ;;  %v739_v24 = vsub.f32 %v723_v15, %v1759_v10 }
 0x260   :  { %1183 = vpow2.f32 %v747_v3  ;;  %v724_v3 = vld [vmem:[%s2145_s4 + $0x58] sm:$0xff] }
 0x261   :  { %v1166_v51 = vpop.eup %1165  ;;  %1185 = vpow2.f32 %v561_v23  ;;  %v573_v39 = vmul.f32 1.442695, %v2163_v17  ;;  %v579_v23 = vmul.f32 1.442695, %v2164_v21 }
 0x262   :  { %627 = vadd.xlane.f32.xlu1 %v1164_v56  ;;  %625 = vadd.xlane.f32.xlu0 %v1166_v51  ;;  %v1168_v62 = vpop.eup %1167  ;;  %1187 = vpow2.f32 %v559_v50  ;;  %v734_v56 = vsub.f32 %v718_v45, %v1717_v18  ;;  %v753_v51 = vmul.f32 1.442695, %v733_v58  ;;  %v518_v50 = vld [vmem:[#allocation3 + $0x8] sm:$0xff]  ;;  %v1781_v58 = vld [vmem:[#allocation2 + $0x60] sm:$0xff] }
 0x263   :  { %v1735_v31 = vpop.eup %1169  ;;  %1189 = vpow2.f32 %v751_v41  ;;  %v581_v5 = vmul.f32 %v1168_v62, %v517_v54  ;;  %2165 = vst [vmem:[#allocation4_spill] sm:$0xff] %v1781_v58  ;;  %v761_v41 = vmul.f32 1.442695, %v737_v48  ;;  %v763_v62 = vmul.f32 1.442695, %v738_v52 }
 0x264   :  { %v1172_v40 = vpop.eup %1171  ;;  %1191 = vpow2.f32 %v565_v35  ;;  %v755_v59 = vmul.f32 1.442695, %v734_v56  ;;  %v2168_v56 = vsub.f32 %v1609_v33, %v1623_v14  ;;  %v741_v36 = vsub.f32 %v725_v63, %v1781_v58  ;;  %v726_v33 = vld [vmem:[%s2145_s4 + $0x68] sm:$0xff] }
 0x265   :  { %v1174_v43 = vpop.eup %1173  ;;  %1193 = vpow2.f32 %v567_v49  ;;  %v584_v25 = vmul.f32 %v1172_v40, %v520_v11  ;;  %v740_v49 = vsub.f32 %v724_v3, %v1770_v30  ;;  %v2169_v40 = vsub.f32 %v1616_v42, %v1626_v16 }
 0x266   :  { %v1754_v9 = vpop.eup %1175  ;;  %1195 = vpow2.f32 %v753_v51  ;;  %v577_v51 = vmul.f32 1.442695, %v2168_v56  ;;  %v582_v44 = vmul.f32 %v1174_v43, %v518_v50  ;;  %v744_v14 = vsub.f32 %v728_v6, %v1788_v20  ;;  %v1857_v56 = vld [vmem:[%s2146_s3 + $0x8] sm:$0xff] }
 0x267   :  { %v1757_v13 = vpop.eup %1177  ;;  %1197 = vpow2.f32 %v759_v55  ;;  %v575_v46 = vmul.f32 1.442695, %v2169_v40  ;;  %v765_v42 = vmul.f32 1.442695, %v739_v24  ;;  %v769_v15 = vmul.f32 1.442695, %v741_v36 }
 0x268   :  { %v1765_v12 = vpop.eup %1179  ;;  %1199 = vpow2.f32 %v569_v1  ;;  %v775_v3 = vmul.f32 1.442695, %v744_v14  ;;  %v1865_v40 = vld [vmem:[%s2146_s3 + $0x10] sm:$0xff] }
 0x269   :  { %v1775_v19 = vpop.eup %1181  ;;  %1201 = vpow2.f32 %v571_v60 }
 0x26a   :  { %v1786_v22 = vpop.eup %1183  ;;  %1203 = vpow2.f32 %v755_v59  ;;  %v583_v59 = vmul.f32 %v1735_v31, %v519_v47  ;;  %v1838_v31 = vld [vmem:[%s2146_s3] sm:$0xff] }
 0x26b   :  { %v1794_v26 = vpop.eup %1185  ;;  %1205 = vpow2.f32 %v757_v61 }
 0x26c   :  { %v1802_v54 = vpop.eup %1187  ;;  %1207 = vpow2.f32 %v573_v39  ;;  %v521_v39 = vld [vmem:[#allocation3 + $0x20] sm:$0xff] }
 0x26d   :  { %v1808_v55 = vpop.eup %1189  ;;  %1209 = vpow2.f32 %v579_v23  ;;  %v585_v24 = vmul.f32 %v1765_v12, %v521_v39  ;;  %v522_v12 = vld [vmem:[#allocation3 + $0x28] sm:$0xff] }
 0x26e   :  { %v1820_v43 = vpop.eup %1191  ;;  %1211 = vpow2.f32 %v761_v41 }
 0x26f   :  { %v1823_v16 = vpop.eup %1193  ;;  %1213 = vpow2.f32 %v763_v62 }
 0x270   :  { %v1825_v11 = vpop.eup %1195  ;;  %1215 = vpow2.f32 %v577_v51  ;;  %v937_v51 = vadd.f32 1e-08, %v1838_v31 }
 0x271   :  { %v1830_v52 = vpop.eup %1197  ;;  %1217 = vpow2.f32 %v575_v46 }
 0x272   :  { %v1833_v21 = vpop.eup %1199  ;;  %1219 = vpow2.f32 %v765_v42  ;;  %v1877_v42 = vld [vmem:[%s2146_s3 + $0x20] sm:$0xff] }
 0x273   :  { %v1840_v50 = vpop.eup %1201 }
 0x2c7   :  { %v598_v4 = vpop.xlane.xlu1 %597 }
 0x2c8   :  { %v629_v34 = vadd.f32 %v598_v4, %v581_v5  ;;  %v743_v5 = vsub.f32 %v727_v37, %v1796_v29  ;;  %v767_v4 = vmul.f32 1.442695, %v740_v49  ;;  %v523_v49 = vld [vmem:[#allocation3 + $0x30] sm:$0xff] }
 0x2ca   :  { %646 = vst.msk [vmem:[#allocation3] sm:$0xff] %vm28_vm0, %v629_v34  ;;  %v742_v34 = vsub.f32 %v726_v33, %v1814_v28  ;;  %1221 = vpow2.f32 %v767_v4  ;;  %v938_v4 = vadd.f32 1e-08, %v1857_v56 }
 0x2cb   :  { %v604_v45 = vpop.xlane.xlu1 %603  ;;  %1223 = vpow2.f32 %v769_v15 }
 0x2cc   :  { %v632_v35 = vadd.f32 %v604_v45, %v584_v25  ;;  %v773_v25 = vmul.f32 1.442695, %v743_v5  ;;  %v1847_v45 = vpop.eup %1203  ;;  %v771_v41 = vmul.f32 1.442695, %v742_v34  ;;  %1225 = vpow2.f32 %v775_v3  ;;  %v524_v3 = vld [vmem:[#allocation3 + $0x38] sm:$0xff] }
 0x2cd   :  { %v587_v5 = vmul.f32 %v1794_v26, %v523_v49  ;;  %v939_v26 = vadd.f32 1e-08, %v1865_v40 }
 0x2ce   :  { %649 = vst.msk [vmem:[#allocation3 + $0x18] sm:$0xff] %vm28_vm0, %v632_v35  ;;  %v600_v1 = vpop.xlane.xlu0 %599  ;;  %v1851_v35 = vpop.eup %1205  ;;  %1227 = vpow2.f32 %v773_v25 }
 0x2cf   :  { %v630_v60 = vadd.f32 %v600_v1, %v582_v44  ;;  %v1860_v44 = vpop.eup %1207 }
 0x2d1   :  { %v697_v48 = vld [vmem:[#allocation3] sm:$0xff]  ;;  %647 = vst.msk [vmem:[#allocation3 + $0x8] sm:$0xff] %vm28_vm0, %v630_v60 }
 0x2d2   :  { %v777_v61 = vsub.f32 %v697_v48, %v1757_v13  ;;  %v602_v17 = vpop.xlane.xlu0 %601  ;;  %v1845_v13 = vld [vmem:[%s2146_s3 + $0x18] sm:$0xff] }
 0x2d3   :  { %v631_v23 = vadd.f32 %v602_v17, %v583_v59  ;;  %v940_v46 = vadd.f32 1e-08, %v1845_v13  ;;  %v586_v59 = vmul.f32 %v1802_v54, %v522_v12  ;;  %v588_v12 = vmul.f32 %v1775_v19, %v524_v3 }
 0x2d4   :  { %v793_v63 = vmax.f32 %v777_v61, 0.0 }
 0x2d5   :  { %v700_v6 = vld [vmem:[#allocation3 + $0x18] sm:$0xff]  ;;  %648 = vst.msk [vmem:[#allocation3 + $0x10] sm:$0xff] %vm28_vm0, %v631_v23  ;;  %v1895_v23 = vld [vmem:[%s2146_s3 + $0x30] sm:$0xff] }
 0x2d6   :  { %v809_v37 = vadd.f32 1e-08, %v793_v63  ;;  %v780_v62 = vsub.f32 %v700_v6, %v1808_v55  ;;  %v1868_v55 = vpop.eup %1209 }
 0x2d7   :  { %v606_v36 = vpop.xlane.xlu0 %605  ;;  %v1870_v14 = vpop.eup %1211 }
 0x2d8   :  { %1229 = vlog2.f32 %v809_v37  ;;  %v698_v1 = vld [vmem:[#allocation3 + $0x8] sm:$0xff]  ;;  %v633_v47 = vadd.f32 %v606_v36, %v585_v24  ;;  %v796_v33 = vmax.f32 %v780_v62, 0.0  ;;  %v1880_v48 = vpop.eup %1213  ;;  %v941_v24 = vadd.f32 1e-08, %v1877_v42  ;;  %v1906_v62 = vld [vmem:[%s2146_s3 + $0x38] sm:$0xff] }
 0x2d9   :  { %v778_v60 = vsub.f32 %v698_v1, %v1786_v22  ;;  %1231 = vpow2.f32 %v771_v41  ;;  %v1887_v22 = vld [vmem:[%s2146_s3 + $0x28] sm:$0xff]  ;;  %v1890_v15 = vpop.eup %1215  ;;  %v943_v1 = vadd.f32 1e-08, %v1895_v23 }
 0x2da   :  { %650 = vst.msk [vmem:[#allocation3 + $0x20] sm:$0xff] %vm28_vm0, %v633_v47  ;;  %v812_v34 = vadd.f32 1e-08, %v796_v33  ;;  %1233 = vrcp.f32 %v937_v51  ;;  %v1897_v54 = vpop.eup %1217  ;;  %v942_v51 = vadd.f32 1e-08, %v1887_v22 }
 0x2db   :  { %v794_v61 = vmax.f32 %v778_v60, 0.0  ;;  %v610_v17 = vpop.xlane.xlu0 %609  ;;  %v608_v39 = vpop.xlane.xlu1 %607  ;;  %1235 = vrcp.f32 %v940_v46  ;;  %v525_v46 = vld [vmem:[#allocation3 + $0x40] sm:$0xff]  ;;  %v526_v60 = vld [vmem:[#allocation3 + $0x48] sm:$0xff] }
 0x2dc   :  { %v699_v25 = vld [vmem:[#allocation3 + $0x10] sm:$0xff]  ;;  %v635_v63 = vadd.f32 %v610_v17, %v587_v5  ;;  %v634_v6 = vadd.f32 %v608_v39, %v586_v59  ;;  %1237 = vlog2.f32 %v812_v34  ;;  %v1900_v41 = vpop.eup %1219  ;;  %v589_v3 = vmul.f32 %v1820_v43, %v525_v46 }
 0x2dd   :  { %v810_v37 = vadd.f32 1e-08, %v794_v61  ;;  %v779_v49 = vsub.f32 %v699_v25, %v1754_v9  ;;  %1239 = vrcp.f32 %v938_v4  ;;  %v1909_v36 = vpop.eup %1221  ;;  %v1917_v9 = vld [vmem:[%s2146_s3 + $0x40] sm:$0xff]  ;;  %v1925_v4 = vld [vmem:[%s2146_s3 + $0x48] sm:$0xff]  ;;  %v527_v34 = vld [vmem:[#allocation3 + $0x50] sm:$0xff] }
 0x2de   :  { %652 = vst.msk [vmem:[#allocation3 + $0x30] sm:$0xff] %vm28_vm0, %v635_v63  ;;  %651 = vst.msk [vmem:[#allocation3 + $0x28] sm:$0xff] %vm28_vm0, %v634_v6  ;;  %1241 = vrcp.f32 %v939_v26  ;;  %v1920_v47 = vpop.eup %1223  ;;  %v1932_v61 = vld [vmem:[%s2146_s3 + $0x50] sm:$0xff]  ;;  %v944_v26 = vadd.f32 1e-08, %v1906_v62  ;;  %v591_v46 = vmul.f32 %v1833_v21, %v527_v34 }
 0x2df   :  { %1243 = vlog2.f32 %v810_v37  ;;  %v612_v33 = vpop.xlane.xlu1 %611  ;;  %v795_v5 = vmax.f32 %v779_v49, 0.0  ;;  %v1927_v19 = vpop.eup %1225  ;;  %v945_v63 = vadd.f32 1e-08, %v1917_v9  ;;  %v590_v37 = vmul.f32 %v1823_v16, %v526_v60  ;;  %v528_v49 = vld [vmem:[#allocation3 + $0x58] sm:$0xff] }
 0x2e0   :  { %v636_v59 = vadd.f32 %v612_v33, %v588_v12  ;;  %1245 = vrcp.f32 %v941_v24  ;;  %v1935_v17 = vpop.eup %1227  ;;  %v529_v12 = vld [vmem:[#allocation3 + $0x60] sm:$0xff]  ;;  %v946_v24 = vadd.f32 1e-08, %v1925_v4 }
 0x2e1   :  { %v701_v39 = vld [vmem:[#allocation3 + $0x20] sm:$0xff]  ;;  %v811_v25 = vadd.f32 1e-08, %v795_v5  ;;  %1247 = vrcp.f32 %v942_v51  ;;  %v947_v51 = vadd.f32 1e-08, %v1932_v61  ;;  %v593_v21 = vmul.f32 %v1860_v44, %v529_v12 }
 0x2e2   :  { %v1230_v6 = vpop.eup %1229  ;;  %653 = vst.msk [vmem:[#allocation3 + $0x38] sm:$0xff] %vm28_vm0, %v636_v59  ;;  %v781_v33 = vsub.f32 %v701_v39, %v1825_v11  ;;  %1249 = vrcp.f32 %v943_v1  ;;  %v1952_v11 = vld [vmem:[%s2146_s3 + $0x58] sm:$0xff]  ;;  %v592_v39 = vmul.f32 %v1840_v50, %v528_v49 }
 0x2e3   :  { %v1943_v20 = vpop.eup %1231  ;;  %v614_v29 = vpop.xlane.xlu0 %613  ;;  %v826_v5 = vmul.f32 0.6931472, %v1230_v6  ;;  %1251 = vlog2.f32 %v811_v25 }
 0x2e4   :  { %v616_v43 = vpop.xlane.xlu1 %615  ;;  %v1947_v59 = vpop.eup %1233  ;;  %v637_v16 = vadd.f32 %v614_v29, %v589_v3  ;;  %v797_v28 = vmax.f32 %v781_v33, 0.0  ;;  %1253 = vrcp.f32 %v944_v26  ;;  %v530_v3 = vld [vmem:[#allocation3 + $0x68] sm:$0xff] }
 0x2e5   :  { %v638_v60 = vadd.f32 %v616_v43, %v590_v37  ;;  %v1954_v1 = vpop.eup %1235  ;;  %v702_v34 = vld [vmem:[#allocation3 + $0x28] sm:$0xff]  ;;  %v703_v25 = vld [vmem:[#allocation3 + $0x30] sm:$0xff]  ;;  %v857_v6 = vadd.f32 %v826_v5, %v1666_v32  ;;  %1255 = vrcp.f32 %v945_v63  ;;  %v532_v37 = vld [vmem:[#allocation3 + $0x78] sm:$0xff]  ;;  %v948_v63 = vadd.f32 1e-08, %v1952_v11 }
 0x2e6   :  { %v1238_v29 = vpop.eup %1237  ;;  %654 = vst.msk [vmem:[#allocation3 + $0x40] sm:$0xff] %vm28_vm0, %v637_v16  ;;  %v782_v26 = vsub.f32 %v702_v34, %v1847_v45  ;;  %v783_v33 = vsub.f32 %v703_v25, %v1851_v35  ;;  %v813_v43 = vadd.f32 1e-08, %v797_v28  ;;  %1257 = vrcp.f32 %v946_v24  ;;  %v1972_v28 = vld [vmem:[%s2146_s3 + $0x60] sm:$0xff]  ;;  %v531_v34 = vld [vmem:[#allocation3 + $0x70] sm:$0xff] }
 0x2e7   :  { %655 = vst.msk [vmem:[#allocation3 + $0x48] sm:$0xff] %vm28_vm0, %v638_v60  ;;  %v1963_v50 = vpop.eup %1239  ;;  %v618_v44 = vpop.xlane.xlu0 %617  ;;  %v832_v12 = vmul.f32 0.6931472, %v1238_v29  ;;  %v905_v32 = vmul.f32 %v1838_v31, %v857_v6  ;;  %1259 = vrcp.f32 %v947_v51  ;;  %v889_v35 = vld [vmem:[%s2147_s2] sm:$0xff]  ;;  %v594_v31 = vmul.f32 %v1897_v54, %v530_v3 }
 0x2e8   :  { %v620_v49 = vpop.xlane.xlu1 %619  ;;  %v1967_v5 = vpop.eup %1241  ;;  %v639_v16 = vadd.f32 %v618_v44, %v591_v46  ;;  %v798_v58 = vmax.f32 %v782_v26, 0.0  ;;  %v799_v45 = vmax.f32 %v783_v33, 0.0  ;;  %v596_v51 = vmul.f32 %v1868_v55, %v532_v37 }
 0x2e9   :  { %v640_v60 = vadd.f32 %v620_v49, %v592_v39  ;;  %v1244_v24 = vpop.eup %1243  ;;  %v704_v25 = vld [vmem:[#allocation3 + $0x38] sm:$0xff]  ;;  %1261 = vlog2.f32 %v813_v43  ;;  %v860_v46 = vadd.f32 %v832_v12, %v1688_v7  ;;  %v921_v43 = vsub.f32 %v889_v35, %v905_v32 }
 0x2ea   :  { %v892_v39 = vld [vmem:[%s2147_s2 + $0x18] sm:$0xff]  ;;  %v1983_v6 = vpop.eup %1245  ;;  %656 = vst.msk [vmem:[#allocation3 + $0x50] sm:$0xff] %vm28_vm0, %v639_v16  ;;  %v784_v29 = vsub.f32 %v704_v25, %v1830_v52  ;;  %v814_v54 = vadd.f32 1e-08, %v798_v58  ;;  %v815_v3 = vadd.f32 1e-08, %v799_v45  ;;  %1263 = vrcp.f32 %v948_v63 }
 0x2eb   :  { %657 = vst.msk [vmem:[#allocation3 + $0x58] sm:$0xff] %vm28_vm0, %v640_v60  ;;  %v828_v26 = vmul.f32 0.6931472, %v1244_v24  ;;  %v1988_v55 = vpop.eup %1247  ;;  %v622_v37 = vpop.xlane.xlu0 %621  ;;  %v908_v7 = vmul.f32 %v1845_v13, %v860_v46  ;;  %v949_v44 = vadd.f32 1e-08, %v1972_v28  ;;  %v1997_v58 = vld [vmem:[%s2146_s3 + $0x68] sm:$0xff]  ;;  %v595_v45 = vmul.f32 %v1890_v15, %v531_v34 }
 0x2ec   :  { %v624_v33 = vpop.xlane.xlu1 %623  ;;  %v1992_v49 = vpop.eup %1249  ;;  %v641_v12 = vadd.f32 %v622_v37, %v593_v21  ;;  %v800_v60 = vmax.f32 %v784_v29, 0.0  ;;  %1265 = vlog2.f32 %v814_v54  ;;  %v890_v15 = vld [vmem:[%s2147_s2 + $0x8] sm:$0xff]  ;;  %v950_v54 = vadd.f32 1e-08, %v1997_v58 }
 0x2ed   :  { %v642_v16 = vadd.f32 %v624_v33, %v594_v31  ;;  %v1252_v52 = vpop.eup %1251  ;;  %v705_v24 = vld [vmem:[#allocation3 + $0x40] sm:$0xff]  ;;  %1267 = vlog2.f32 %v815_v3  ;;  %v858_v32 = vadd.f32 %v828_v26, %v1679_v57  ;;  %v924_v63 = vsub.f32 %v892_v39, %v908_v7 }
 0x2ee   :  { %v706_v13 = vld [vmem:[#allocation3 + $0x48] sm:$0xff]  ;;  %v2001_v35 = vpop.eup %1253  ;;  %658 = vst.msk [vmem:[#allocation3 + $0x60] sm:$0xff] %vm28_vm0, %v641_v12  ;;  %v785_v21 = vsub.f32 %v705_v24, %v1870_v14  ;;  %v816_v25 = vadd.f32 1e-08, %v800_v60  ;;  %v830_v46 = vmul.f32 0.6931472, %v1252_v52  ;;  %v954_v3 = vmul.f32 %v1947_v59, %v921_v43 }
 0x2ef   :  { %659 = vst.msk [vmem:[#allocation3 + $0x68] sm:$0xff] %vm28_vm0, %v642_v16  ;;  %v786_v31 = vsub.f32 %v706_v13, %v1880_v48  ;;  %v2010_v34 = vpop.eup %1255  ;;  %v626_v57 = vpop.xlane.xlu0 %625  ;;  %v906_v29 = vmul.f32 %v1857_v56, %v858_v32  ;;  %1269 = vrcp.f32 %v949_v44  ;;  %v960_v56 = vmul.f32 %v1954_v1, %v924_v63 }
 0x2f0   :  { %v628_v39 = vpop.xlane.xlu1 %627  ;;  %v2015_v14 = vpop.eup %1257  ;;  %v643_v48 = vadd.f32 %v626_v57, %v595_v45  ;;  %v801_v37 = vmax.f32 %v785_v21, 0.0  ;;  %1271 = vlog2.f32 %v816_v25  ;;  %v859_v60 = vadd.f32 %v830_v46, %v1658_v2  ;;  %v891_v45 = vld [vmem:[%s2147_s2 + $0x10] sm:$0xff] }
 0x2f1   :  { %v644_v26 = vadd.f32 %v628_v39, %v596_v51  ;;  %v802_v33 = vmax.f32 %v786_v31, 0.0  ;;  %v2017_v7 = vpop.eup %1259  ;;  %v707_v12 = vld [vmem:[#allocation3 + $0x50] sm:$0xff]  ;;  %v922_v52 = vsub.f32 %v890_v15, %v906_v29  ;;  %1273 = vrcp.f32 %v950_v54 }
 0x2f2   :  { %v708_v16 = vld [vmem:[#allocation3 + $0x58] sm:$0xff]  ;;  %660 = vst.msk [vmem:[#allocation3 + $0x70] sm:$0xff] %vm28_vm0, %v643_v48  ;;  %v787_v59 = vsub.f32 %v707_v12, %v1900_v41  ;;  %v817_v43 = vadd.f32 1e-08, %v801_v37  ;;  %v907_v2 = vmul.f32 %v1865_v40, %v859_v60  ;;  %v985_v1 = vsel %vm28_vm0, %v954_v3, 0.0  ;;  %v893_v60 = vld [vmem:[%s2147_s2 + $0x20] sm:$0xff] }
 0x2f3   :  { %661 = vst.msk [vmem:[#allocation3 + $0x78] sm:$0xff] %vm28_vm0, %v644_v26  ;;  %v788_v51 = vsub.f32 %v708_v16, %v1909_v36  ;;  %v818_v44 = vadd.f32 1e-08, %v802_v33  ;;  %v1262_v24 = vpop.eup %1261  ;;  %v956_v13 = vmul.f32 %v1963_v50, %v922_v52  ;;  %v990_v15 = vsel %vm28_vm0, %v960_v56, 0.0 }
 0x2f4   :  { %v803_v32 = vmax.f32 %v787_v59, 0.0  ;;  %v834_v21 = vmul.f32 0.6931472, %v1262_v24  ;;  %1275 = vlog2.f32 %v817_v43  ;;  %v2031_v41 = vpop.eup %1263  ;;  %v923_v25 = vsub.f32 %v891_v45, %v907_v2  ;;  %v894_v45 = vld [vmem:[%s2147_s2 + $0x28] sm:$0xff] }
 0x2f5   :  { %v804_v63 = vmax.f32 %v788_v51, 0.0  ;;  %v709_v36 = vld [vmem:[#allocation3 + $0x60] sm:$0xff]  ;;  %1277 = vlog2.f32 %v818_v44  ;;  %v986_v46 = vsel %vm28_vm0, %v956_v13, 0.0 }
 0x2f6   :  { %v710_v31 = vld [vmem:[#allocation3 + $0x68] sm:$0xff]  ;;  %v1266_v40 = vpop.eup %1265  ;;  %v789_v50 = vsub.f32 %v709_v36, %v1920_v47  ;;  %v819_v39 = vadd.f32 1e-08, %v803_v32  ;;  %v861_v48 = vadd.f32 %v834_v21, %v1699_v53  ;;  %v958_v26 = vmul.f32 %v1967_v5, %v923_v25 }
 0x2f7   :  { %v790_v57 = vsub.f32 %v710_v31, %v1943_v20  ;;  %v820_v29 = vadd.f32 1e-08, %v804_v63  ;;  %v1268_v54 = vpop.eup %1267  ;;  %v836_v3 = vmul.f32 0.6931472, %v1266_v40  ;;  %v987_v37 = vadd.f32 %v986_v46, %v985_v1 }
 0x2f8   :  { %v805_v33 = vmax.f32 %v789_v50, 0.0  ;;  %v838_v16 = vmul.f32 0.6931472, %v1268_v54  ;;  %1279 = vlog2.f32 %v819_v39  ;;  %v909_v53 = vmul.f32 %v1877_v42, %v861_v48  ;;  %v2065_v39 = vld [vmem:[%s2146_s3 + $0x70] sm:$0xff] }
 0x2f9   :  { %v806_v12 = vmax.f32 %v790_v57, 0.0  ;;  %v2042_v47 = vpop.eup %1269  ;;  %v711_v20 = vld [vmem:[#allocation3 + $0x70] sm:$0xff]  ;;  %1281 = vlog2.f32 %v820_v29  ;;  %v862_v56 = vadd.f32 %v836_v3, %v1717_v18  ;;  %v988_v5 = vsel %vm28_vm0, %v958_v26, 0.0 }
 0x2fa   :  { %v712_v52 = vld [vmem:[#allocation3 + $0x78] sm:$0xff]  ;;  %v791_v59 = vsub.f32 %v711_v20, %v1935_v17  ;;  %v821_v43 = vadd.f32 1e-08, %v805_v33  ;;  %v1272_v24 = vpop.eup %1271  ;;  %v863_v2 = vadd.f32 %v838_v16, %v1726_v0  ;;  %v925_v18 = vsub.f32 %v893_v60, %v909_v53  ;;  %v897_v16 = vld [vmem:[%s2147_s2 + $0x40] sm:$0xff] }
 0x2fb   :  { %v792_v51 = vsub.f32 %v712_v52, %v1927_v19  ;;  %v822_v44 = vadd.f32 1e-08, %v806_v12  ;;  %v910_v13 = vmul.f32 %v1887_v22, %v862_v56  ;;  %v989_v1 = vadd.f32 %v988_v5, %v987_v37  ;;  %v895_v19 = vld [vmem:[%s2147_s2 + $0x30] sm:$0xff]  ;;  %v2057_v17 = vpop.eup %1273 }
 0x2fc   :  { %v807_v42 = vmax.f32 %v791_v59, 0.0  ;;  %v840_v63 = vmul.f32 0.6931472, %v1272_v24  ;;  %1283 = vlog2.f32 %v821_v43  ;;  %v911_v21 = vmul.f32 %v1895_v23, %v863_v2  ;;  %v896_v23 = vld [vmem:[%s2147_s2 + $0x38] sm:$0xff] }
 0x2fd   :  { %v808_v32 = vmax.f32 %v792_v51, 0.0  ;;  %1285 = vlog2.f32 %v822_v44  ;;  %v926_v36 = vsub.f32 %v894_v45, %v910_v13  ;;  %v962_v0 = vmul.f32 %v1983_v6, %v925_v18 }
 0x2fe   :  { %v1276_v31 = vpop.eup %1275  ;;  %v823_v22 = vadd.f32 1e-08, %v807_v42  ;;  %v864_v46 = vadd.f32 %v840_v63, %v1705_v27  ;;  %v991_v40 = vadd.f32 %v990_v15, %v989_v1  ;;  %v927_v29 = vsub.f32 %v895_v19, %v911_v21  ;;  %v2075_v27 = vld [vmem:[%s2146_s3 + $0x78] sm:$0xff]  ;;  %v2171_v21 = vld [vmem:[#allocation4_spill] sm:$0xff] }
 0x2ff   :  { %v824_v25 = vadd.f32 1e-08, %v808_v32  ;;  %v1278_v50 = vpop.eup %1277  ;;  %v842_v57 = vmul.f32 0.6931472, %v1276_v31  ;;  %v964_v6 = vmul.f32 %v1988_v55, %v926_v36  ;;  %v992_v54 = vsel %vm28_vm0, %v962_v0, 0.0 }
 0x300   :  { %v844_v3 = vmul.f32 0.6931472, %v1278_v50  ;;  %1287 = vlog2.f32 %v823_v22  ;;  %v912_v15 = vmul.f32 %v1906_v62, %v864_v46  ;;  %v993_v48 = vadd.f32 %v992_v54, %v991_v40 }
 0x301   :  { %1289 = vlog2.f32 %v824_v25  ;;  %v865_v26 = vadd.f32 %v842_v57, %v1737_v38  ;;  %v966_v37 = vmul.f32 %v1992_v49, %v927_v29  ;;  %v994_v33 = vsel %vm28_vm0, %v964_v6, 0.0  ;;  %v898_v38 = vld [vmem:[%s2147_s2 + $0x48] sm:$0xff]  ;;  %v2172_v25 = vld [vmem:[#allocation7_spill] sm:$0xff] }
 0x302   :  { %v1280_v55 = vpop.eup %1279  ;;  %v866_v12 = vadd.f32 %v844_v3, %v1746_v8  ;;  %v928_v60 = vsub.f32 %v896_v23, %v912_v15  ;;  %v951_v20 = vadd.f32 1e-08, %v2065_v39  ;;  %v995_v52 = vadd.f32 %v994_v33, %v993_v48  ;;  %v2173_v48 = vld [vmem:[#allocation6_spill] sm:$0xff] }
 0x303   :  { %v1282_v62 = vpop.eup %1281  ;;  %v846_v56 = vmul.f32 0.6931472, %v1280_v55  ;;  %v913_v49 = vmul.f32 %v1917_v9, %v865_v26  ;;  %v952_v53 = vadd.f32 1e-08, %v2075_v27  ;;  %v996_v8 = vsel %vm28_vm0, %v966_v37, 0.0  ;;  %v899_v9 = vld [vmem:[%s2147_s2 + $0x50] sm:$0xff] }
 0x304   :  { %v848_v5 = vmul.f32 0.6931472, %v1282_v62  ;;  %v914_v59 = vmul.f32 %v1925_v4, %v866_v12  ;;  %v968_v51 = vmul.f32 %v2001_v35, %v928_v60  ;;  %v997_v43 = vadd.f32 %v996_v8, %v995_v52  ;;  %v900_v4 = vld [vmem:[%s2147_s2 + $0x58] sm:$0xff]  ;;  %v2174_v55 = vld [vmem:[#allocation5_spill] sm:$0xff] }
 0x305   :  { %v867_v44 = vadd.f32 %v846_v56, %v1759_v10  ;;  %v929_v45 = vsub.f32 %v897_v16, %v913_v49  ;;  %1291 = vrcp.f32 %v951_v20 }
 0x306   :  { %v1284_v24 = vpop.eup %1283  ;;  %v868_v2 = vadd.f32 %v848_v5, %v1770_v30  ;;  %v930_v13 = vsub.f32 %v898_v38, %v914_v59  ;;  %v998_v18 = vsel %vm28_vm0, %v968_v51, 0.0  ;;  %1293 = vrcp.f32 %v952_v53 }
 0x307   :  { %v1286_v1 = vpop.eup %1285  ;;  %v850_v42 = vmul.f32 0.6931472, %v1284_v24  ;;  %v915_v10 = vmul.f32 %v1932_v61, %v867_v44  ;;  %v970_v35 = vmul.f32 %v2010_v34, %v929_v45  ;;  %v999_v19 = vadd.f32 %v998_v18, %v997_v43  ;;  %v901_v61 = vld [vmem:[%s2147_s2 + $0x60] sm:$0xff] }
 0x308   :  { %v852_v30 = vmul.f32 0.6931472, %v1286_v1  ;;  %v916_v32 = vmul.f32 %v1952_v11, %v868_v2  ;;  %v972_v63 = vmul.f32 %v2015_v14, %v930_v13  ;;  %v902_v11 = vld [vmem:[%s2147_s2 + $0x68] sm:$0xff] }
 0x309   :  { %v869_v36 = vadd.f32 %v850_v42, %v2171_v21  ;;  %v931_v0 = vsub.f32 %v899_v9, %v915_v10  ;;  %v1000_v31 = vsel %vm28_vm0, %v970_v35, 0.0 }
 0x30a   :  { %v1288_v22 = vpop.eup %1287  ;;  %v870_v46 = vadd.f32 %v852_v30, %v2172_v25  ;;  %v932_v34 = vsub.f32 %v900_v4, %v916_v32  ;;  %v1001_v40 = vadd.f32 %v1000_v31, %v999_v19  ;;  %v1002_v29 = vsel %vm28_vm0, %v972_v63, 0.0 }
 0x30b   :  { %v1290_v50 = vpop.eup %1289  ;;  %v854_v57 = vmul.f32 0.6931472, %v1288_v22  ;;  %v917_v14 = vmul.f32 %v1972_v28, %v869_v36  ;;  %v974_v23 = vmul.f32 %v2017_v7, %v931_v0  ;;  %v903_v28 = vld [vmem:[%s2147_s2 + $0x70] sm:$0xff] }
 0x30c   :  { %v856_v6 = vmul.f32 0.6931472, %v1290_v50  ;;  %v918_v54 = vmul.f32 %v1997_v58, %v870_v46  ;;  %v976_v3 = vmul.f32 %v2031_v41, %v932_v34  ;;  %v1003_v15 = vadd.f32 %v1002_v29, %v1001_v40  ;;  %v904_v58 = vld [vmem:[%s2147_s2 + $0x78] sm:$0xff] }
 0x30d   :  { %v871_v26 = vadd.f32 %v854_v57, %v2173_v48  ;;  %v933_v37 = vsub.f32 %v901_v61, %v917_v14  ;;  %v1004_v33 = vsel %vm28_vm0, %v974_v23, 0.0 }
 0x30e   :  { %v872_v12 = vadd.f32 %v856_v6, %v2174_v55  ;;  %v934_v7 = vsub.f32 %v902_v11, %v918_v54  ;;  %v1005_v16 = vadd.f32 %v1004_v33, %v1003_v15  ;;  %v1006_v20 = vsel %vm28_vm0, %v976_v3, 0.0 }
 0x30f   :  { %v919_v41 = vmul.f32 %v2065_v39, %v871_v26  ;;  %v978_v60 = vmul.f32 %v2042_v47, %v933_v37  ;;  %v1292_v52 = vpop.eup %1291 }
 0x310   :  { %v920_v62 = vmul.f32 %v2075_v27, %v872_v12  ;;  %v980_v56 = vmul.f32 %v2057_v17, %v934_v7  ;;  %v1007_v38 = vadd.f32 %v1006_v20, %v1005_v16  ;;  %v1294_v49 = vpop.eup %1293 }
 0x311   :  { %v935_v53 = vsub.f32 %v903_v28, %v919_v41  ;;  %v1008_v8 = vsel %vm28_vm0, %v978_v60, 0.0 }
 0x312   :  { %v936_v5 = vsub.f32 %v904_v58, %v920_v62  ;;  %v1009_v59 = vadd.f32 %v1008_v8, %v1007_v38  ;;  %v1010_v43 = vsel %vm28_vm0, %v980_v56, 0.0 }
 0x313   :  { %v982_v51 = vmul.f32 %v1292_v52, %v935_v53 }
 0x314   :  { %v984_v39 = vmul.f32 %v1294_v49, %v936_v5  ;;  %v1011_v44 = vadd.f32 %v1010_v43, %v1009_v59 }
 0x315   :  { %v1012_v47 = vsel %vm28_vm0, %v982_v51, 0.0 }
 0x316   :  { %v1013_v45 = vadd.f32 %v1012_v47, %v1011_v44  ;;  %v1014_v24 = vsel %vm28_vm0, %v984_v39, 0.0 }
 0x318   :  { %v1015_v27 = vadd.f32 %v1014_v24, %v1013_v45 }
 0x31a   :  { %1016 = vadd.xlane.f32.xlu0 %v1015_v27 }
 0x3a7   :  { %v1017_v17 = vpop.xlane.xlu0 %1016 }
 0x3a8   :  { %v1018_v2 = vrot.slane %v1017_v17, 4 }
 0x3aa   :  { %v1019_v9 = vadd.f32 %v1018_v2, %v1017_v17 }
 0x3ac   :  { %v1020_v13 = vrot.slane %v1019_v9, 2 }
 0x3ae   :  { %v1021_v18 = vadd.f32 %v1020_v13, %v1019_v9 }
 0x3b0   :  { %v1022_v1 = vrot.slane %v1021_v18, 1 }
 0x3b2   :  { %v1023_v42 = vadd.f32 %v1022_v1, %v1021_v18 }
 0x3b4   :  { %1112 = vpush %v1023_v42 }
 0x3e5   :  { %s1113_s2 = spop %1112 }
 0x3e6   :  { %v1025_v4 = vstv %s1113_s2 }
 0x3e7   :  { %1026 = vst [vmem:[%s2148_s6] sm:$0x1] %v1025_v4 }

</bundles_post_ra>
